<compile_context>
chip_gen: v6e
topology: v6e:2x2x1
jax: 0.10.0
libtpu: 0.0.40
codegen_flags: <defaults>
</compile_context>

<pallas_src>
import jax
import jax.numpy as jnp
from jax import lax
from jax.experimental import pallas as pl
from jax.experimental.pallas import tpu as pltpu

BOARD_SIZE = 8
IN_DIM = BOARD_SIZE * BOARD_SIZE      # 64
HID = 256
OUT_DIM = BOARD_SIZE * BOARD_SIZE     # 64


# ----------------------------- Pallas kernel ------------------------------ #
def _mlp_kernel(x_ref, w1_ref, b1_ref, w2_ref, b2_ref, w3_ref, b3_ref, o_ref):
    """relu(x@W1+b1) -> relu(.@W2+b2) -> .@W3+b3, fully in VMEM."""
    h = jnp.dot(x_ref[...], w1_ref[...],
                preferred_element_type=jnp.float32,
                precision=lax.Precision.HIGHEST) + b1_ref[...]
    h = jnp.maximum(h, 0.0)
    h = jnp.dot(h, w2_ref[...],
                preferred_element_type=jnp.float32,
                precision=lax.Precision.HIGHEST) + b2_ref[...]
    h = jnp.maximum(h, 0.0)
    out = jnp.dot(h, w3_ref[...],
                  preferred_element_type=jnp.float32,
                  precision=lax.Precision.HIGHEST) + b3_ref[...]
    o_ref[...] = out.astype(o_ref.dtype)


# ------------------------------- Wrapper ----------------------------------- #
def prepare_params(params):
    """One-time conversion from PyTorch layout to kernel layout."""
    return {
        "w1": params["fc1_w"].T.astype(jnp.float32),              # (64, 256)
        "b1": params["fc1_b"].reshape(1, HID).astype(jnp.float32),
        "w2": params["fc2_w"].T.astype(jnp.float32),              # (256, 256)
        "b2": params["fc2_b"].reshape(1, HID).astype(jnp.float32),
        "w3": params["fc3_w"].T.astype(jnp.float32),              # (256, 64)
        "b3": params["fc3_b"].reshape(1, OUT_DIM).astype(jnp.float32),
    }


def gomoku_forward(x, prep):
    """Pallas-backed forward, semantics identical to GomokuNetV1.forward."""
    B = x.shape[0]
    xf = x.reshape(B, IN_DIM).astype(jnp.float32)

    # Pad M to a sublane multiple; tile with up to 256 rows per grid step.
    tile_m = 256 if B >= 256 else max(8, ((B + 7) // 8) * 8)
    m_pad = ((B + tile_m - 1) // tile_m) * tile_m
    if m_pad != B:
        xf = jnp.pad(xf, ((0, m_pad - B), (0, 0)))

    out = pl.pallas_call(
        _mlp_kernel,
        out_shape=jax.ShapeDtypeStruct((m_pad, OUT_DIM), jnp.float32),
        grid=(m_pad // tile_m,),
        in_specs=[
            pl.BlockSpec((tile_m, IN_DIM), lambda i: (i, 0)),   # x tile
            pl.BlockSpec((IN_DIM, HID), lambda i: (0, 0)),      # W1
            pl.BlockSpec((1, HID), lambda i: (0, 0)),           # b1
            pl.BlockSpec((HID, HID), lambda i: (0, 0)),         # W2
            pl.BlockSpec((1, HID), lambda i: (0, 0)),           # b2
            pl.BlockSpec((HID, OUT_DIM), lambda i: (0, 0)),     # W3
            pl.BlockSpec((1, OUT_DIM), lambda i: (0, 0)),       # b3
        ],
        out_specs=pl.BlockSpec((tile_m, OUT_DIM), lambda i: (i, 0)),
        compiler_params=pltpu.CompilerParams(
            dimension_semantics=("parallel",),
            vmem_limit_bytes=32 << 20,
        ),
    )(xf, prep["w1"], prep["b1"], prep["w2"], prep["b2"], prep["w3"], prep["b3"])
    return out[:B]


# ------------------------ Parameters & reference ---------------------------- #
def init_params(key):
    """Deterministic synthetic parameters in PyTorch layouts."""
    ks = jax.random.split(key, 6)

    def rnd(k, shape, scale):
        return jax.random.normal(k, shape, dtype=jnp.float32) * scale

    return {
        "fc1_w": rnd(ks[0], (HID, IN_DIM), 0.05),     # (256, 64)
        "fc1_b": rnd(ks[1], (HID,), 0.1),
        "fc2_w": rnd(ks[2], (HID, HID), 0.05),        # (256, 256)
        "fc2_b": rnd(ks[3], (HID,), 0.1),
        "fc3_w": rnd(ks[4], (OUT_DIM, HID), 0.05),    # (64, 256)
        "fc3_b": rnd(ks[5], (OUT_DIM,), 0.1),
    }


def gomoku_forward_ref(x, params):
    """Pure-JAX reference matching PyTorch GomokuNetV1 semantics."""
    B = x.shape[0]
    h = x.reshape(B, IN_DIM).astype(jnp.float32)
    h = jax.nn.relu(h @ params["fc1_w"].T + params["fc1_b"])
    h = jax.nn.relu(h @ params["fc2_w"].T + params["fc2_b"])
    return h @ params["fc3_w"].T + params["fc3_b"]


if __name__ == "__main__":
    key = jax.random.PRNGKey(0)
    k_params, k_x = jax.random.split(key)
    params = init_params(k_params)
    prep = prepare_params(params)

    # small deterministic input: batch=2 flattened Gomoku boards (8*8 = 64)
    x = jax.random.normal(k_x, (2, BOARD_SIZE * BOARD_SIZE), dtype=jnp.float32)

    out = jax.block_until_ready(gomoku_forward(x, prep))
    ref = jax.block_until_ready(gomoku_forward_ref(x, params))

    assert out.shape == (2, OUT_DIM), out.shape
    assert jnp.allclose(out, ref, rtol=1e-3, atol=1e-3), (
        float(jnp.max(jnp.abs(out - ref))))
    print("KERNEL_OK")
</pallas_src>

<mosaic_0001>
module attributes {stable_mosaic.version = 11 : i64} {
  func.func @_mlp_kernel(%arg0: i32, %arg1: memref<8x64xf32, #tpu.memory_space<vmem>>, %arg2: memref<64x256xf32, #tpu.memory_space<vmem>>, %arg3: memref<1x256xf32, #tpu.memory_space<vmem>>, %arg4: memref<256x256xf32, #tpu.memory_space<vmem>>, %arg5: memref<1x256xf32, #tpu.memory_space<vmem>>, %arg6: memref<256x64xf32, #tpu.memory_space<vmem>>, %arg7: memref<1x64xf32, #tpu.memory_space<vmem>>, %arg8: memref<8x64xf32, #tpu.memory_space<vmem>>) attributes {dimension_semantics = [#tpu.dimension_semantics<parallel>], iteration_bounds = array<i64: 1>, scalar_prefetch = 0 : i64, scratch_operands = 0 : i64, tpu.core_type = #tpu.core_type<tc>, window_params = [{transform_indices = @transform_0, window_bounds = array<i64: 8, 64>}, {pipeline_mode = #tpu.pipeline_mode<synchronous>, transform_indices = @transform_1, window_bounds = array<i64: 64, 256>}, {pipeline_mode = #tpu.pipeline_mode<synchronous>, transform_indices = @transform_2, window_bounds = array<i64: 1, 256>}, {pipeline_mode = #tpu.pipeline_mode<synchronous>, transform_indices = @transform_3, window_bounds = array<i64: 256, 256>}, {pipeline_mode = #tpu.pipeline_mode<synchronous>, transform_indices = @transform_4, window_bounds = array<i64: 1, 256>}, {pipeline_mode = #tpu.pipeline_mode<synchronous>, transform_indices = @transform_5, window_bounds = array<i64: 256, 64>}, {pipeline_mode = #tpu.pipeline_mode<synchronous>, transform_indices = @transform_6, window_bounds = array<i64: 1, 64>}, {transform_indices = @transform_7, window_bounds = array<i64: 8, 64>}]} {
    %c0 = arith.constant 0 : index
    %c0_0 = arith.constant 0 : index
    %0 = vector.load %arg1[%c0, %c0_0] : memref<8x64xf32, #tpu.memory_space<vmem>>, vector<8x64xf32>
    %c0_1 = arith.constant 0 : index
    %c0_2 = arith.constant 0 : index
    %1 = vector.load %arg2[%c0_1, %c0_2] : memref<64x256xf32, #tpu.memory_space<vmem>>, vector<64x256xf32>
    %cst = arith.constant dense<0.000000e+00> : vector<8x256xf32>
    %2 = tpu.matmul %0, %1, %cst {dimension_numbers = #tpu.dot_dimension_numbers<[1], [0], [0], [1], [0, 0, 1, 1], [], []>, precision = #tpu.contract_precision<fp32>} : vector<8x64xf32>, vector<64x256xf32>, vector<8x256xf32> -> vector<8x256xf32>
    %c0_3 = arith.constant 0 : index
    %c0_4 = arith.constant 0 : index
    %3 = vector.load %arg3[%c0_3, %c0_4] : memref<1x256xf32, #tpu.memory_space<vmem>>, vector<1x256xf32>
    %4 = vector.broadcast %3 : vector<1x256xf32> to vector<8x256xf32>
    %5 = arith.addf %2, %4 : vector<8x256xf32>
    %cst_5 = arith.constant 0.000000e+00 : f32
    %6 = vector.broadcast %cst_5 : f32 to vector<8x256xf32>
    %7 = arith.maximumf %5, %6 : vector<8x256xf32>
    %c0_6 = arith.constant 0 : index
    %c0_7 = arith.constant 0 : index
    %8 = vector.load %arg4[%c0_6, %c0_7] : memref<256x256xf32, #tpu.memory_space<vmem>>, vector<256x256xf32>
    %cst_8 = arith.constant dense<0.000000e+00> : vector<8x256xf32>
    %9 = tpu.matmul %7, %8, %cst_8 {dimension_numbers = #tpu.dot_dimension_numbers<[1], [0], [0], [1], [0, 0, 1, 1], [], []>, precision = #tpu.contract_precision<fp32>} : vector<8x256xf32>, vector<256x256xf32>, vector<8x256xf32> -> vector<8x256xf32>
    %c0_9 = arith.constant 0 : index
    %c0_10 = arith.constant 0 : index
    %10 = vector.load %arg5[%c0_9, %c0_10] : memref<1x256xf32, #tpu.memory_space<vmem>>, vector<1x256xf32>
    %11 = vector.broadcast %10 : vector<1x256xf32> to vector<8x256xf32>
    %12 = arith.addf %9, %11 : vector<8x256xf32>
    %cst_11 = arith.constant 0.000000e+00 : f32
    %13 = vector.broadcast %cst_11 : f32 to vector<8x256xf32>
    %14 = arith.maximumf %12, %13 : vector<8x256xf32>
    %c0_12 = arith.constant 0 : index
    %c0_13 = arith.constant 0 : index
    %15 = vector.load %arg6[%c0_12, %c0_13] : memref<256x64xf32, #tpu.memory_space<vmem>>, vector<256x64xf32>
    %cst_14 = arith.constant dense<0.000000e+00> : vector<8x64xf32>
    %16 = tpu.matmul %14, %15, %cst_14 {dimension_numbers = #tpu.dot_dimension_numbers<[1], [0], [0], [1], [0, 0, 1, 1], [], []>, precision = #tpu.contract_precision<fp32>} : vector<8x256xf32>, vector<256x64xf32>, vector<8x64xf32> -> vector<8x64xf32>
    %c0_15 = arith.constant 0 : index
    %c0_16 = arith.constant 0 : index
    %17 = vector.load %arg7[%c0_15, %c0_16] : memref<1x64xf32, #tpu.memory_space<vmem>>, vector<1x64xf32>
    %18 = vector.broadcast %17 : vector<1x64xf32> to vector<8x64xf32>
    %19 = arith.addf %16, %18 : vector<8x64xf32>
    %c0_17 = arith.constant 0 : index
    %c0_18 = arith.constant 0 : index
    %20 = vector.load %arg8[%c0_17, %c0_18] : memref<8x64xf32, #tpu.memory_space<vmem>>, vector<8x64xf32>
    tpu.vector_store %arg8[%c0_17, %c0_18], %19 {strides = array<i32>} : memref<8x64xf32, #tpu.memory_space<vmem>>, vector<8x64xf32>,
    return
  }
  func.func @transform_0(%arg0: i32) -> (i32, i32) {
    %c0_i32 = arith.constant 0 : i32
    %c0_i32_0 = arith.constant 0 : i32
    return %arg0, %c0_i32 : i32, i32
  }
  func.func @transform_1(%arg0: i32) -> (i32, i32) {
    %c0_i32 = arith.constant 0 : i32
    %c0_i32_0 = arith.constant 0 : i32
    %c0_i32_1 = arith.constant 0 : i32
    return %c0_i32, %c0_i32_0 : i32, i32
  }
  func.func @transform_2(%arg0: i32) -> (i32, i32) {
    %c0_i32 = arith.constant 0 : i32
    %c0_i32_0 = arith.constant 0 : i32
    %c0_i32_1 = arith.constant 0 : i32
    return %c0_i32, %c0_i32_0 : i32, i32
  }
  func.func @transform_3(%arg0: i32) -> (i32, i32) {
    %c0_i32 = arith.constant 0 : i32
    %c0_i32_0 = arith.constant 0 : i32
    %c0_i32_1 = arith.constant 0 : i32
    return %c0_i32, %c0_i32_0 : i32, i32
  }
  func.func @transform_4(%arg0: i32) -> (i32, i32) {
    %c0_i32 = arith.constant 0 : i32
    %c0_i32_0 = arith.constant 0 : i32
    %c0_i32_1 = arith.constant 0 : i32
    return %c0_i32, %c0_i32_0 : i32, i32
  }
  func.func @transform_5(%arg0: i32) -> (i32, i32) {
    %c0_i32 = arith.constant 0 : i32
    %c0_i32_0 = arith.constant 0 : i32
    %c0_i32_1 = arith.constant 0 : i32
    return %c0_i32, %c0_i32_0 : i32, i32
  }
  func.func @transform_6(%arg0: i32) -> (i32, i32) {
    %c0_i32 = arith.constant 0 : i32
    %c0_i32_0 = arith.constant 0 : i32
    %c0_i32_1 = arith.constant 0 : i32
    return %c0_i32, %c0_i32_0 : i32, i32
  }
  func.func @transform_7(%arg0: i32) -> (i32, i32) {
    %c0_i32 = arith.constant 0 : i32
    %c0_i32_0 = arith.constant 0 : i32
    return %arg0, %c0_i32 : i32, i32
  }
}

</mosaic_0001>

<bundles_post_ra>
// kernel: tpu_custom_call.1
= control target key start
LH: loop header
LB: loop body
LE: loop exit
PB: predicated region body
PF: predicated region fallthrough
CT: control target
= control target key end

     0   :  { %12 = vsyncpa [#allocation3], 0  ;;  %s5262_s0 = inlined_call_operand.vmem [shape: f32[8,64], index: 0, kind: input, shape index: {}]   ;;  %s5263_s1 = inlined_call_operand.vmem [shape: f32[64,256], index: 1, kind: input, shape index: {}]   ;;  %s5264_s2 = inlined_call_operand.vmem [shape: f32[1,256], index: 2, kind: input, shape index: {}]   ;;  %s5265_s3 = inlined_call_operand.hbm [shape: f32[256,256], index: 3, kind: input, shape index: {}]   ;;  %s5266_s4 = inlined_call_operand.vmem [shape: f32[1,256], index: 4, kind: input, shape index: {}]   ;;  %s5267_s5 = inlined_call_operand.vmem [shape: f32[256,64], index: 5, kind: input, shape index: {}]   ;;  %s5268_s6 = inlined_call_operand.vmem [shape: f32[1,64], index: 6, kind: input, shape index: {}]   ;;  %s5269_s7 = inlined_call_operand.hbm [shape: f32[8,64], index: 7, kind: output, shape index: {}]  }
   0x1   :  { %13 = vsyncpa [#allocation4], 0  ;;  %s3262_s24 = smov [#allocation2]  }
   0x2   :  { %s25_s25 = sshll.u32 %s3262_s24, 4  ;;  %s26_s25 = int_to_ptr.vmem [resolvable:$true] %s25_s25 }
   0x3   :  { %s3226_s26 = scalar_lea.vmem %s26_s25, 8192  ;;  %p3231_p1 = scmp.lt.s32.totalorder %s26_s25, %s26_s25 }
   0x4   :  { %p3227_p0 = scmp.ne.s32.totalorder %s26_s25, %s3226_s26  ;;  %p3232_p2 = scmp.lt.s32.totalorder %s3226_s26, %s3226_s26 }
   0x6   :  { %p3233_p3 = por %p3232_p2, %p3231_p1 }
   0x8   :  { %p3234_p4 = pnand %p3233_p3, %p3227_p0 }
   0xa   :  { %3237 = shalt.err (!%p3234_p4)
}
   0xb   :  { %s3263_s27 = smov 256   ;;  %s3264_s28 = smov 16  }
   0xc   :  { %31 = dma.hbm_to_vmem [thread:$0]  %s5265_s3, 8192, %s26_s25, [#allocation3], %s3263_s27, %s3263_s27, %s3264_s28  }
   0xd   :  { %3258 = dma.done.wait [#allocation3], 8192  }
   0xe   :  { %3259 = vsyncadd [#allocation3], 4294959104  ;;  %v3265_v0 = vmov 0.0   ;;  %v57_v1 = vld [vmem:[%s5263_s1 + $0x78] sm:$0xff]  ;;  %v56_v2 = vld [vmem:[%s5263_s1 + $0x70] sm:$0xff]  ;;  %vm70_vm0 = vcmask 523264  }
   0xf   :  { %154 = vmatprep.mubr.f32.mxu0 %v3265_v0  ;;  %310 = vmatprep.mubr.f32.mxu1 %v3265_v0  ;;  %v55_v3 = vld [vmem:[%s5263_s1 + $0x68] sm:$0xff]  ;;  %v3321_v4 = vand.u32 4294901760, %v57_v1  ;;  %v3323_v5 = vand.u32 4294901760, %v56_v2  ;;  %v54_v7 = vld [vmem:[%s5263_s1 + $0x60] sm:$0xff]  ;;  %v53_v8 = vld [vmem:[%s5263_s1 + $0x58] sm:$0xff]  ;;  %s3266_s28 = smov [#allocation5]  }
  0x10   :  { %v3325_v6 = vand.u32 4294901760, %v55_v3  ;;  %v52_v9 = vld [vmem:[%s5263_s1 + $0x50] sm:$0xff]  ;;  %v3336_v10 = vand.u32 4294901760, %v54_v7  ;;  %v3338_v11 = vand.u32 4294901760, %v53_v8  ;;  %v51_v13 = vld [vmem:[%s5263_s1 + $0x48] sm:$0xff]  ;;  %v50_v14 = vld [vmem:[%s5263_s1 + $0x40] sm:$0xff] }
  0x11   :  { %v3340_v12 = vand.u32 4294901760, %v52_v9  ;;  %v49_v15 = vld [vmem:[%s5263_s1 + $0x38] sm:$0xff]  ;;  %91 = vmatprep.subr.mxu0 %v3321_v4  ;;  %v3352_v16 = vand.u32 4294901760, %v51_v13  ;;  %v3354_v17 = vand.u32 4294901760, %v50_v14  ;;  %v3359_v19 = vsub.f32 %v57_v1, %v3321_v4  ;;  %v48_v20 = vld [vmem:[%s5263_s1 + $0x30] sm:$0xff]  ;;  %v3367_v21 = vld [vmem:[%s5263_s1 + $0x28] sm:$0xff] }
  0x12   :  { %v3356_v18 = vand.u32 4294901760, %v49_v15  ;;  %v3372_v22 = vld [vmem:[%s5263_s1 + $0x20] sm:$0xff]  ;;  %93 = vmatpush1.msra.mxu0 %v3323_v5  ;;  %v3375_v23 = vand.u32 4294901760, %v48_v20  ;;  %v3378_v24 = vsub.f32 %v56_v2, %v3323_v5  ;;  %v3381_v25 = vand.u32 4294901760, %v3367_v21  ;;  %v3389_v27 = vld [vmem:[%s5263_s1 + $0x18] sm:$0xff]  ;;  %v3394_v28 = vld [vmem:[%s5263_s1 + $0x10] sm:$0xff] }
  0x13   :  { %v3384_v26 = vsub.f32 %v55_v3, %v3325_v6  ;;  %v3399_v29 = vld [vmem:[%s5263_s1 + $0x8] sm:$0xff]  ;;  %95 = vmatprep.subr.mxu0 %v3325_v6  ;;  %v184_v30 = vand.u32 4294901760, %v3359_v19  ;;  %v3404_v31 = vand.u32 4294901760, %v3372_v22  ;;  %v3407_v32 = vsub.f32 %v54_v7, %v3336_v10  ;;  %v3424_v38 = vld [vmem:[%s5263_s1] sm:$0xff]  ;;  %s2993_s29 = sshll.u32 %s3266_s28, 4  ;;  %s2994_s29 = int_to_ptr.vmem [resolvable:$true] %s2993_s29 }
  0x14   :  { %v3410_v33 = vand.u32 4294901760, %v3389_v27  ;;  %97 = vmatpush1.msra.mxu0 %v3336_v10  ;;  %v190_v34 = vand.u32 4294901760, %v3378_v24  ;;  %v3416_v36 = vsub.f32 %v53_v8, %v3338_v11  ;;  %v3419_v37 = vand.u32 4294901760, %v3394_v28  ;;  %v41_v51 = vld [vmem:[%s5262_s0] sm:$0xff]  ;;  %p3243_p6 = scmp.lt.s32.totalorder %s2994_s29, %s2994_s29 }
  0x15   :  { %v196_v35 = vand.u32 4294901760, %v3384_v26  ;;  %99 = vmatprep.subr.mxu0 %v3338_v11  ;;  %v185_v39 = vsub.f32 %v3359_v19, %v184_v30  ;;  %v202_v40 = vand.u32 4294901760, %v3407_v32  ;;  %v3432_v41 = vsub.f32 %v52_v9, %v3340_v12 }
  0x16   :  { %v3435_v42 = vand.u32 4294901760, %v3399_v29  ;;  %101 = vmatpush1.msra.mxu0 %v3340_v12  ;;  %v191_v43 = vsub.f32 %v3378_v24, %v190_v34  ;;  %v208_v45 = vand.u32 4294901760, %v3416_v36  ;;  %v3446_v46 = vsub.f32 %v51_v13, %v3352_v16 }
  0x17   :  { %v197_v44 = vsub.f32 %v3384_v26, %v196_v35  ;;  %103 = vmatprep.subr.mxu0 %v3352_v16  ;;  %v186_v47 = vand.u32 4294901760, %v185_v39  ;;  %v203_v48 = vsub.f32 %v3407_v32, %v202_v40  ;;  %v214_v49 = vand.u32 4294901760, %v3432_v41 }
  0x18   :  { %v3454_v50 = vand.u32 4294901760, %v3424_v38  ;;  %105 = vmatpush1.msra.mxu0 %v3354_v17  ;;  %v192_v52 = vand.u32 4294901760, %v191_v43  ;;  %v209_v54 = vsub.f32 %v3416_v36, %v208_v45  ;;  %v220_v55 = vand.u32 4294901760, %v3446_v46 }
  0x19   :  { %v198_v53 = vand.u32 4294901760, %v197_v44  ;;  %107 = vmatprep.subr.mxu0 %v3356_v18  ;;  %187 = vmatprep.subr.mxu1 %v186_v47  ;;  %v204_v56 = vand.u32 4294901760, %v203_v48  ;;  %v215_v57 = vsub.f32 %v3432_v41, %v214_v49  ;;  %v3469_v58 = vsub.f32 %v50_v14, %v3354_v17 }
  0x1a   :  { %v3472_v59 = vsub.f32 %v49_v15, %v3356_v18  ;;  %109 = vmatpush1.msra.mxu0 %v3375_v23  ;;  %193 = vmatpush1.msra.mxu1 %v192_v52  ;;  %v210_v60 = vand.u32 4294901760, %v209_v54  ;;  %v221_v61 = vsub.f32 %v3446_v46, %v220_v55  ;;  %v72_v62 = vsel %vm70_vm0, %v41_v51, 0 }
  0x1b   :  { %v3480_v63 = vsub.f32 %v48_v20, %v3375_v23  ;;  %111 = vmatprep.subr.mxu0 %v3381_v25  ;;  %199 = vmatprep.subr.mxu1 %v198_v53  ;;  %v216_v1 = vand.u32 4294901760, %v215_v57  ;;  %v226_v2 = vand.u32 4294901760, %v3469_v58  ;;  %v3485_v7 = vand.u32 4294901760, %v72_v62 }
  0x1c   :  { %v232_v3 = vand.u32 4294901760, %v3472_v59  ;;  %113 = vmatpush1.msra.mxu0 %v3404_v31  ;;  %205 = vmatpush1.msra.mxu1 %v204_v56  ;;  %v222_v8 = vand.u32 4294901760, %v221_v61  ;;  %v3491_v13 = vsub.f32 %v3367_v21, %v3381_v25  ;;  %v3495_v14 = vsub.f32 %v3372_v22, %v3404_v31 }
  0x1d   :  { %v238_v9 = vand.u32 4294901760, %v3480_v63  ;;  %115 = vmatprep.subr.mxu0 %v3410_v33  ;;  %211 = vmatprep.subr.mxu1 %v210_v60  ;;  %v227_v15 = vsub.f32 %v3469_v58, %v226_v2  ;;  %v3505_v39 = vsub.f32 %v72_v62, %v3485_v7  ;;  %v3515_v44 = vsub.f32 %v3389_v27, %v3410_v33 }
  0x1e   :  { %v233_v20 = vsub.f32 %v3472_v59, %v232_v3  ;;  %117 = vmatpush1.msra.mxu0 %v3419_v37  ;;  %217 = vmatpush1.msra.mxu1 %v216_v1  ;;  %v244_v22 = vand.u32 4294901760, %v3491_v13  ;;  %v250_v43 = vand.u32 4294901760, %v3495_v14  ;;  %v3521_v52 = vsub.f32 %v3394_v28, %v3419_v37 }
  0x1f   :  { %v239_v21 = vsub.f32 %v3480_v63, %v238_v9  ;;  %119 = vmatprep.subr.mxu0 %v3435_v42  ;;  %223 = vmatprep.subr.mxu1 %v222_v8  ;;  %v228_v47 = vand.u32 4294901760, %v227_v15  ;;  %v157_v51 = vand.u32 4294901760, %v3505_v39  ;;  %v256_v56 = vand.u32 4294901760, %v3515_v44 }
  0x20   :  { %v234_v48 = vand.u32 4294901760, %v233_v20  ;;  %121 = vmatpush1.msra.mxu0 %v3454_v50  ;;  %v245_v54 = vsub.f32 %v3491_v13, %v244_v22  ;;  %v251_v27 = vsub.f32 %v3495_v14, %v250_v43  ;;  %v262_v57 = vand.u32 4294901760, %v3521_v52 }
  0x21   :  { %v240_v53 = vand.u32 4294901760, %v239_v21  ;;  %229 = vmatpush1.msra.mxu1 %v228_v47  ;;  %336 = vmatprep.subr.mxu0 %v3359_v19  ;;  %v158_v28 = vsub.f32 %v3505_v39, %v157_v51  ;;  %v3538_v60 = vsub.f32 %v3399_v29, %v3435_v42  ;;  %v3542_v61 = vsub.f32 %v3424_v38, %v3454_v50 }
  0x22   :  { %235 = vmatprep.subr.mxu1 %v234_v48  ;;  %v246_v62 = vand.u32 4294901760, %v245_v54  ;;  %v252_v1 = vand.u32 4294901760, %v251_v27  ;;  %v257_v8 = vsub.f32 %v3515_v44, %v256_v56  ;;  %v263_v20 = vsub.f32 %v3521_v52, %v262_v57 }
  0x23   :  { %v159_v15 = vand.u32 4294901760, %v158_v28  ;;  %241 = vmatpush1.msra.mxu1 %v240_v53  ;;  %v268_v29 = vand.u32 4294901760, %v3538_v60  ;;  %v274_v21 = vand.u32 4294901760, %v3542_v61  ;;  %v754_v28 = vld [vmem:[#allocation2 + $0xf8] sm:$0xff] }
  0x24   :  { %247 = vmatprep.subr.mxu1 %v246_v62  ;;  %v258_v38 = vand.u32 4294901760, %v257_v8  ;;  %v264_v47 = vand.u32 4294901760, %v263_v20  ;;  %v753_v62 = vld [vmem:[#allocation2 + $0xf0] sm:$0xff]  ;;  %v3593_v8 = vand.u32 4294901760, %v754_v28 }
  0x25   :  { %160 = vmatmul.mubr.f32.vlgmr.msra.gmra.mxu0 %v159_v15  ;;  %253 = vmatpush1.msra.mxu1 %v252_v1  ;;  %v269_v48 = vsub.f32 %v3538_v60, %v268_v29  ;;  %v275_v53 = vsub.f32 %v3542_v61, %v274_v21  ;;  %v752_v1 = vld [vmem:[#allocation2 + $0xe8] sm:$0xff]  ;;  %v3598_v19 = vand.u32 4294901760, %v753_v62 }
  0x26   :  { %339 = vmatpush1.msra.mxu0 %v3378_v24  ;;  %259 = vmatprep.subr.mxu1 %v258_v38  ;;  %5588 = vst [vmem:[#allocation8_spill] sm:$0xff] %v3593_v8  ;;  %v3603_v24 = vand.u32 4294901760, %v752_v1 }
  0x27   :  { %342 = vmatprep.subr.mxu0 %v3384_v26  ;;  %265 = vmatpush1.msra.mxu1 %v264_v47  ;;  %v270_v54 = vand.u32 4294901760, %v269_v48  ;;  %v276_v27 = vand.u32 4294901760, %v275_v53  ;;  %v3612_v26 = vsub.f32 %v754_v28, %v3593_v8  ;;  %v738_v48 = vld [vmem:[#allocation2 + $0x78] sm:$0xff]  ;;  %v737_v28 = vld [vmem:[#allocation2 + $0x70] sm:$0xff] }
  0x28   :  { %345 = vmatpush1.msra.mxu0 %v3407_v32  ;;  %414 = vmatprep.mubr.f32.mxu0 %v3265_v0 }
  0x29   :  { %348 = vmatprep.subr.mxu0 %v3416_v36  ;;  %271 = vmatprep.subr.mxu1 %v270_v54  ;;  %5589 = vst [vmem:[#allocation9_spill] sm:$0xff] %v3612_v26  ;;  %v3626_v36 = vsub.f32 %v752_v1, %v3603_v24 }
  0x2a   :  { %351 = vmatpush1.msra.mxu0 %v3432_v41  ;;  %277 = vmatpush1.msra.mxu1 %v276_v27 }
  0x2b   :  { %354 = vmatprep.subr.mxu0 %v3446_v46  ;;  %312 = vmatmul.mubr.f32.vlgmr.msra.gmra.mxu1 %v3485_v7  ;;  %v5290_v46 = vand.u32 4294901760, %v3612_v26 }
  0x2c   :  { %357 = vmatpush1.msra.mxu0 %v3469_v58  ;;  %440 = vmatprep.subr.mxu1 %v3321_v4 }
  0x2d   :  { %360 = vmatprep.subr.mxu0 %v3472_v59  ;;  %442 = vmatpush1.msra.mxu1 %v3323_v5  ;;  %v746_v59 = vld [vmem:[#allocation2 + $0xb8] sm:$0xff] }
  0x2e   :  { %363 = vmatpush1.msra.mxu0 %v3480_v63  ;;  %444 = vmatprep.subr.mxu1 %v3325_v6 }
  0x2f   :  { %366 = vmatprep.subr.mxu0 %v3491_v13  ;;  %446 = vmatpush1.msra.mxu1 %v3336_v10 }
  0x30   :  { %369 = vmatpush1.msra.mxu0 %v3495_v14  ;;  %448 = vmatprep.subr.mxu1 %v3338_v11  ;;  %v3669_v14 = vand.u32 4294901760, %v746_v59 }
  0x31   :  { %372 = vmatprep.subr.mxu0 %v3515_v44  ;;  %450 = vmatpush1.msra.mxu1 %v3340_v12 }
  0x32   :  { %375 = vmatpush1.msra.mxu0 %v3521_v52  ;;  %452 = vmatprep.subr.mxu1 %v3352_v16  ;;  %v741_v52 = vld [vmem:[#allocation2 + $0x90] sm:$0xff]  ;;  %v3714_v20 = vsub.f32 %v746_v59, %v3669_v14  ;;  %v735_v59 = vld [vmem:[#allocation2 + $0x60] sm:$0xff] }
  0x33   :  { %378 = vmatprep.subr.mxu0 %v3538_v60  ;;  %454 = vmatpush1.msra.mxu1 %v3354_v17  ;;  %v3725_v47 = vand.u32 4294901760, %v741_v52 }
  0x34   :  { %381 = vmatpush1.msra.mxu0 %v3542_v61  ;;  %456 = vmatprep.subr.mxu1 %v3356_v18  ;;  %v740_v61 = vld [vmem:[#allocation2 + $0x88] sm:$0xff] }
  0x35   :  { %417 = vmatmul.mubr.f32.vlgmr.msra.gmra.mxu0 %v3505_v39  ;;  %532 = vmatprep.subr.mxu0 %v184_v30  ;;  %v751_v30 = vld [vmem:[#allocation2 + $0xe0] sm:$0xff]  ;;  %v3734_v27 = vand.u32 4294901760, %v740_v61 }
  0x36   :  { %458 = vmatpush1.msra.mxu1 %v3375_v23  ;;  %536 = vmatpush1.msra.mxu0 %v190_v34  ;;  %v3614_v32 = vand.u32 4294901760, %v751_v30  ;;  %v750_v34 = vld [vmem:[#allocation2 + $0xd8] sm:$0xff] }
  0x37   :  { %460 = vmatprep.subr.mxu1 %v3381_v25  ;;  %540 = vmatprep.subr.mxu0 %v196_v35  ;;  %v3619_v35 = vsub.f32 %v753_v62, %v3598_v19  ;;  %v3631_v41 = vand.u32 4294901760, %v750_v34 }
  0x38   :  { %462 = vmatpush1.msra.mxu1 %v3404_v31  ;;  %544 = vmatpush1.msra.mxu0 %v202_v40  ;;  %v749_v40 = vld [vmem:[#allocation2 + $0xd0] sm:$0xff] }
  0x39   :  { %464 = vmatprep.subr.mxu1 %v3410_v33  ;;  %548 = vmatprep.subr.mxu0 %v208_v45  ;;  %v748_v45 = vld [vmem:[#allocation2 + $0xc8] sm:$0xff]  ;;  %v3644_v58 = vand.u32 4294901760, %v749_v40 }
  0x3a   :  { %466 = vmatpush1.msra.mxu1 %v3419_v37  ;;  %552 = vmatpush1.msra.mxu0 %v214_v49  ;;  %v3638_v49 = vsub.f32 %v751_v30, %v3614_v32  ;;  %v3650_v63 = vand.u32 4294901760, %v748_v45 }
  0x3b   :  { %468 = vmatprep.subr.mxu1 %v3435_v42  ;;  %556 = vmatprep.subr.mxu0 %v220_v55  ;;  %v747_v55 = vld [vmem:[#allocation2 + $0xc0] sm:$0xff] }
  0x3c   :  { %470 = vmatpush1.msra.mxu1 %v3454_v50  ;;  %503 = vmatprep.mubr.f32.mxu1 %v3265_v0  ;;  %v5286_v13 = vand.u32 4294901760, %v3638_v49  ;;  %v3693_v44 = vsub.f32 %v748_v45, %v3650_v63 }
  0x3d   :  { %560 = vmatpush1.msra.mxu0 %v226_v2  ;;  %507 = vmatmul.mubr.f32.vlgmr.msra.gmra.mxu1 %v157_v51  ;;  %v745_v2 = vld [vmem:[#allocation2 + $0xb0] sm:$0xff] }
  0x3e   :  { %564 = vmatprep.subr.mxu0 %v232_v3  ;;  %650 = vmatprep.subr.mxu1 %v3321_v4  ;;  %v5288_v4 = vand.u32 4294901760, %v3619_v35  ;;  %v3658_v3 = vand.u32 4294901760, %v747_v55  ;;  %v5270_v54 = vand.u32 4294901760, %v3693_v44 }
  0x3f   :  { %568 = vmatpush1.msra.mxu0 %v238_v9  ;;  %652 = vmatpush1.msra.mxu1 %v3323_v5  ;;  %v5287_v5 = vand.u32 4294901760, %v3626_v36  ;;  %v744_v9 = vld [vmem:[#allocation2 + $0xa8] sm:$0xff] }
  0x40   :  { %572 = vmatprep.subr.mxu0 %v244_v22  ;;  %654 = vmatprep.subr.mxu1 %v3325_v6  ;;  %v3656_v6 = vsub.f32 %v750_v34, %v3631_v41  ;;  %v3677_v39 = vsub.f32 %v3619_v35, %v5288_v4  ;;  %v3682_v22 = vand.u32 4294901760, %v745_v2  ;;  %v3695_v51 = vand.u32 4294901760, %v744_v9  ;;  %v736_v34 = vld [vmem:[#allocation2 + $0x68] sm:$0xff] }
  0x41   :  { %576 = vmatpush1.msra.mxu0 %v250_v43  ;;  %656 = vmatpush1.msra.mxu1 %v3336_v10  ;;  %v3666_v10 = vsub.f32 %v3612_v26, %v5290_v46  ;;  %v742_v43 = vld [vmem:[#allocation2 + $0x98] sm:$0xff] }
  0x42   :  { %580 = vmatprep.subr.mxu0 %v256_v56  ;;  %658 = vmatprep.subr.mxu1 %v3338_v11  ;;  %v743_v11 = vld [vmem:[#allocation2 + $0xa0] sm:$0xff]  ;;  %v5273_v56 = vand.u32 4294901760, %v3656_v6  ;;  %v954_v38 = vand.u32 4294901760, %v3677_v39  ;;  %v3774_v39 = vsub.f32 %v740_v61, %v3734_v27 }
  0x43   :  { %584 = vmatpush1.msra.mxu0 %v262_v57  ;;  %660 = vmatpush1.msra.mxu1 %v3340_v12  ;;  %v3680_v12 = vsub.f32 %v749_v40, %v3644_v58  ;;  %v3701_v57 = vsub.f32 %v747_v55, %v3658_v3  ;;  %v3703_v60 = vand.u32 4294901760, %v743_v11  ;;  %v948_v15 = vand.u32 4294901760, %v3666_v10 }
  0x44   :  { %588 = vmatprep.subr.mxu0 %v268_v29  ;;  %662 = vmatprep.subr.mxu1 %v3352_v16  ;;  %v3690_v16 = vsub.f32 %v3626_v36, %v5287_v5  ;;  %v3716_v29 = vand.u32 4294901760, %v742_v43  ;;  %v971_v62 = vsub.f32 %v3656_v6, %v5273_v56  ;;  %v3754_v55 = vand.u32 4294901760, %v738_v48 }
  0x45   :  { %592 = vmatpush1.msra.mxu0 %v274_v21  ;;  %625 = vmatprep.mubr.f32.mxu0 %v3265_v0  ;;  %v739_v21 = vld [vmem:[#allocation2 + $0x80] sm:$0xff]  ;;  %v3743_v1 = vsub.f32 %v743_v11, %v3703_v60  ;;  %v3765_v10 = vand.u32 4294901760, %v737_v28  ;;  %v983_v11 = vsub.f32 %v3693_v44, %v5270_v54 }
  0x46   :  { %664 = vmatpush1.msra.mxu1 %v3354_v17  ;;  %627 = vmatmul.mubr.f32.vlgmr.msra.gmra.mxu0 %v3485_v7  ;;  %v3711_v17 = vsub.f32 %v3638_v49, %v5286_v13  ;;  %v960_v53 = vand.u32 4294901760, %v3690_v16  ;;  %v3745_v30 = vand.u32 4294901760, %v739_v21  ;;  %v3752_v45 = vsub.f32 %v742_v43, %v3716_v29 }
  0x47   :  { %666 = vmatprep.subr.mxu1 %v3356_v18  ;;  %713 = vmatprep.mubr.f32.mxu1 %v3265_v0  ;;  %v5272_v18 = vand.u32 4294901760, %v3680_v12  ;;  %v3723_v0 = vsub.f32 %v745_v2, %v3682_v22  ;;  %v3776_v43 = vand.u32 4294901760, %v736_v34  ;;  %v972_v61 = vand.u32 4294901760, %v971_v62 }
  0x48   :  { %668 = vmatpush1.msra.mxu1 %v3375_v23  ;;  %800 = vmatprep.subr.mxu0 %v3593_v8  ;;  %v3732_v23 = vsub.f32 %v744_v9, %v3695_v51  ;;  %v966_v40 = vand.u32 4294901760, %v3711_v17  ;;  %v3763_v9 = vsub.f32 %v741_v52, %v3725_v47  ;;  %v3785_v52 = vsub.f32 %v739_v21, %v3745_v30 }
  0x49   :  { %670 = vmatprep.subr.mxu1 %v3381_v25  ;;  %802 = vmatpush1.msra.mxu0 %v3598_v19  ;;  %v5271_v25 = vand.u32 4294901760, %v3701_v57  ;;  %v977_v2 = vsub.f32 %v3680_v12, %v5272_v18  ;;  %v3787_v17 = vand.u32 4294901760, %v735_v59  ;;  %v5284_v54 = vand.u32 4294901760, %v3752_v45 }
  0x4a   :  { %672 = vmatpush1.msra.mxu1 %v3404_v31  ;;  %804 = vmatprep.subr.mxu0 %v3603_v24  ;;  %v5285_v31 = vand.u32 4294901760, %v3714_v20  ;;  %v5277_v56 = vand.u32 4294901760, %v3763_v9  ;;  %v3811_v62 = vsub.f32 %v736_v34, %v3776_v43 }
  0x4b   :  { %674 = vmatprep.subr.mxu1 %v3410_v33  ;;  %806 = vmatpush1.msra.mxu0 %v3614_v32  ;;  %v5276_v33 = vand.u32 4294901760, %v3723_v0  ;;  %v989_v16 = vsub.f32 %v3701_v57, %v5271_v25  ;;  %v3795_v25 = vsub.f32 %v738_v48, %v3754_v55  ;;  %v978_v18 = vand.u32 4294901760, %v977_v2 }
  0x4c   :  { %676 = vmatpush1.msra.mxu1 %v3419_v37  ;;  %808 = vmatprep.subr.mxu0 %v3631_v41  ;;  %v5274_v37 = vand.u32 4294901760, %v3732_v23  ;;  %5592 = vst [vmem:[#allocation12_spill] sm:$0xff] %v3811_v62  ;;  %v1019_v34 = vsub.f32 %v3752_v45, %v5284_v54 }
  0x4d   :  { %678 = vmatprep.subr.mxu1 %v3435_v42  ;;  %810 = vmatpush1.msra.mxu0 %v3644_v58  ;;  %v5275_v42 = vand.u32 4294901760, %v3743_v1  ;;  %5590 = vst [vmem:[#allocation10_spill] sm:$0xff] %v3795_v25  ;;  %v1001_v21 = vsub.f32 %v3723_v0, %v5276_v33  ;;  %v990_v2 = vand.u32 4294901760, %v989_v16 }
  0x4e   :  { %680 = vmatpush1.msra.mxu1 %v3454_v50  ;;  %812 = vmatprep.subr.mxu0 %v3650_v63  ;;  %v995_v50 = vsub.f32 %v3714_v20, %v5285_v31  ;;  %v1007_v48 = vsub.f32 %v3732_v23, %v5274_v37  ;;  %v727_v31 = vld [vmem:[#allocation2 + $0x20] sm:$0xff] }
  0x4f   :  { %715 = vmatmul.mubr.f32.vlgmr.msra.gmra.mxu1 %v3485_v7  ;;  %949 = vmatprep.subr.mxu1 %v948_v15  ;;  %v3803_v7 = vsub.f32 %v737_v28, %v3765_v10  ;;  %v984_v15 = vand.u32 4294901760, %v983_v11  ;;  %v1013_v28 = vsub.f32 %v3743_v1, %v5275_v42  ;;  %v3819_v11 = vsub.f32 %v735_v59, %v3787_v17 }
  0x50   :  { %955 = vmatpush1.msra.mxu1 %v954_v38  ;;  %814 = vmatpush1.msra.mxu0 %v3658_v3  ;;  %v5278_v38 = vand.u32 4294901760, %v3774_v39  ;;  %v996_v37 = vand.u32 4294901760, %v995_v50  ;;  %v1002_v16 = vand.u32 4294901760, %v1001_v21  ;;  %v1025_v42 = vsub.f32 %v3763_v9, %v5277_v56 }
  0x51   :  { %5591 = vst [vmem:[#allocation11_spill] sm:$0xff] %v3803_v7  ;;  %961 = vmatprep.subr.mxu1 %v960_v53  ;;  %816 = vmatprep.subr.mxu0 %v3669_v14  ;;  %v5283_v53 = vand.u32 4294901760, %v3785_v52  ;;  %5593 = vst [vmem:[#allocation13_spill] sm:$0xff] %v3819_v11  ;;  %v5281_v33 = vand.u32 4294901760, %v3803_v7  ;;  %v1008_v59 = vand.u32 4294901760, %v1007_v48  ;;  %v5279_v50 = vand.u32 4294901760, %v3811_v62 }
  0x52   :  { %967 = vmatpush1.msra.mxu1 %v966_v40  ;;  %818 = vmatpush1.msra.mxu0 %v3682_v22  ;;  %v5282_v40 = vand.u32 4294901760, %v3795_v25  ;;  %v5280_v56 = vand.u32 4294901760, %v3819_v11 }
  0x53   :  { %973 = vmatprep.subr.mxu1 %v972_v61  ;;  %820 = vmatprep.subr.mxu0 %v3695_v51  ;;  %v1031_v61 = vsub.f32 %v3774_v39, %v5278_v38  ;;  %v1037_v21 = vsub.f32 %v3785_v52, %v5283_v53  ;;  %v1026_v38 = vand.u32 4294901760, %v1025_v42 }
  0x54   :  { %979 = vmatpush1.msra.mxu1 %v978_v18  ;;  %822 = vmatpush1.msra.mxu0 %v3703_v60  ;;  %v1014_v18 = vand.u32 4294901760, %v1013_v28  ;;  %v1043_v48 = vsub.f32 %v3795_v25, %v5282_v40  ;;  %v1061_v42 = vsub.f32 %v3819_v11, %v5280_v56  ;;  %v733_v56 = vld [vmem:[#allocation2 + $0x50] sm:$0xff]  ;;  %v728_v40 = vld [vmem:[#allocation2 + $0x28] sm:$0xff]  ;;  %v3911_v11 = vand.u32 4294901760, %v727_v31 }
  0x55   :  { %985 = vmatprep.subr.mxu1 %v984_v15  ;;  %824 = vmatprep.subr.mxu0 %v3716_v29  ;;  %v1020_v15 = vand.u32 4294901760, %v1019_v34  ;;  %v1032_v28 = vand.u32 4294901760, %v1031_v61  ;;  %v1038_v34 = vand.u32 4294901760, %v1037_v21  ;;  %v3904_v4 = vand.u32 4294901760, %v728_v40 }
  0x56   :  { %991 = vmatpush1.msra.mxu1 %v990_v2  ;;  %826 = vmatpush1.msra.mxu0 %v3725_v47  ;;  %v1049_v2 = vsub.f32 %v3803_v7, %v5281_v33  ;;  %5603 = vst [vmem:[#allocation23_spill] sm:$0xff] %v3911_v11 }
  0x57   :  { %997 = vmatprep.subr.mxu1 %v996_v37  ;;  %828 = vmatprep.subr.mxu0 %v3734_v27  ;;  %v1055_v37 = vsub.f32 %v3811_v62, %v5279_v50  ;;  %v1062_v50 = vand.u32 4294901760, %v1061_v42  ;;  %5602 = vst [vmem:[#allocation22_spill] sm:$0xff] %v3904_v4  ;;  %v3918_v7 = vsub.f32 %v728_v40, %v3904_v4 }
  0x58   :  { %1003 = vmatpush1.msra.mxu1 %v1002_v16  ;;  %830 = vmatpush1.msra.mxu0 %v3745_v30  ;;  %v1044_v16 = vand.u32 4294901760, %v1043_v48  ;;  %v732_v48 = vld [vmem:[#allocation2 + $0x48] sm:$0xff] }
  0x59   :  { %1009 = vmatprep.subr.mxu1 %v1008_v59  ;;  %832 = vmatprep.subr.mxu0 %v3754_v55  ;;  %v1050_v59 = vand.u32 4294901760, %v1049_v2  ;;  %v1056_v61 = vand.u32 4294901760, %v1055_v37  ;;  %v3866_v2 = vand.u32 4294901760, %v732_v48  ;;  %5604 = vst [vmem:[#allocation24_spill] sm:$0xff] %v3918_v7 }
  0x5a   :  { %1015 = vmatpush1.msra.mxu1 %v1014_v18  ;;  %834 = vmatpush1.msra.mxu0 %v3765_v10  ;;  %v734_v18 = vld [vmem:[#allocation2 + $0x58] sm:$0xff] }
  0x5b   :  { %1021 = vmatprep.subr.mxu1 %v1020_v15  ;;  %836 = vmatprep.subr.mxu0 %v3776_v43  ;;  %v3859_v21 = vand.u32 4294901760, %v734_v18  ;;  %v3861_v15 = vand.u32 4294901760, %v733_v56 }
  0x5c   :  { %1027 = vmatpush1.msra.mxu1 %v1026_v38  ;;  %838 = vmatpush1.msra.mxu0 %v3787_v17 }
  0x5d   :  { %1033 = vmatprep.subr.mxu1 %v1032_v28  ;;  %v3864_v38 = vsub.f32 %v734_v18, %v3859_v21  ;;  %v731_v28 = vld [vmem:[#allocation2 + $0x40] sm:$0xff]  ;;  %840 = vmatprep.subr.mxu0 %v3859_v21  ;;  %v3870_v37 = vsub.f32 %v733_v56, %v3861_v15 }
  0x5e   :  { %1039 = vmatpush1.msra.mxu1 %v1038_v34  ;;  %v3872_v34 = vand.u32 4294901760, %v731_v28  ;;  %842 = vmatpush1.msra.mxu0 %v3861_v15 }
  0x5f   :  { %1045 = vmatprep.subr.mxu1 %v1044_v16  ;;  %5594 = vst [vmem:[#allocation14_spill] sm:$0xff] %v3864_v38  ;;  %5595 = vst [vmem:[#allocation15_spill] sm:$0xff] %v3870_v37  ;;  %v5289_v42 = vand.u32 4294901760, %v3864_v38  ;;  %v3877_v16 = vsub.f32 %v732_v48, %v3866_v2  ;;  %844 = vmatprep.subr.mxu0 %v3866_v2  ;;  %v5295_v18 = vand.u32 4294901760, %v3870_v37 }
  0x60   :  { %1051 = vmatpush1.msra.mxu1 %v1050_v59  ;;  %v3884_v56 = vsub.f32 %v731_v28, %v3872_v34  ;;  %846 = vmatpush1.msra.mxu0 %v3872_v34 }
  0x61   :  { %1057 = vmatprep.subr.mxu1 %v1056_v61  ;;  %5596 = vst [vmem:[#allocation16_spill] sm:$0xff] %v3877_v16  ;;  %v729_v61 = vld [vmem:[#allocation2 + $0x30] sm:$0xff]  ;;  %v1067_v48 = vsub.f32 %v3864_v38, %v5289_v42  ;;  %v5302_v53 = vand.u32 4294901760, %v3877_v16  ;;  %v1073_v28 = vsub.f32 %v3870_v37, %v5295_v18  ;;  %v726_v42 = vld [vmem:[#allocation2 + $0x18] sm:$0xff] }
  0x62   :  { %1063 = vmatpush1.msra.mxu1 %v1062_v50  ;;  %v730_v50 = vld [vmem:[#allocation2 + $0x38] sm:$0xff]  ;;  %5598 = vst [vmem:[#allocation18_spill] sm:$0xff] %v3884_v56  ;;  %v3886_v33 = vand.u32 4294901760, %v729_v61  ;;  %v5307_v13 = vand.u32 4294901760, %v3884_v56  ;;  %v725_v18 = vld [vmem:[#allocation2 + $0x10] sm:$0xff] }
  0x63   :  { %v3879_v59 = vand.u32 4294901760, %v730_v50  ;;  %v1068_v46 = vand.u32 4294901760, %v1067_v48  ;;  %v1074_v37 = vand.u32 4294901760, %v1073_v28  ;;  %v724_v48 = vld [vmem:[#allocation2 + $0x8] sm:$0xff]  ;;  %v3925_v28 = vsub.f32 %v727_v31, %v3911_v11 }
  0x64   :  { %5599 = vst [vmem:[#allocation19_spill] sm:$0xff] %v3886_v33  ;;  %v3902_v5 = vsub.f32 %v729_v61, %v3886_v33  ;;  %v1085_v61 = vsub.f32 %v3884_v56, %v5307_v13  ;;  %v723_v13 = vld [vmem:[#allocation2] sm:$0xff] }
  0x65   :  { %5597 = vst [vmem:[#allocation17_spill] sm:$0xff] %v3879_v59  ;;  %v3894_v54 = vsub.f32 %v730_v50, %v3879_v59  ;;  %848 = vmatprep.subr.mxu0 %v3879_v59  ;;  %v1079_v50 = vsub.f32 %v3877_v16, %v5302_v53  ;;  %1069 = vmatprep.subr.mxu1 %v1068_v46  ;;  %5605 = vst [vmem:[#allocation25_spill] sm:$0xff] %v3925_v28  ;;  %v5320_v46 = vand.u32 4294901760, %v3918_v7 }
  0x66   :  { %5601 = vst [vmem:[#allocation21_spill] sm:$0xff] %v3902_v5  ;;  %850 = vmatpush1.msra.mxu0 %v3886_v33  ;;  %v5317_v62 = vand.u32 4294901760, %v3902_v5  ;;  %v3927_v33 = vand.u32 4294901760, %v726_v42  ;;  %1075 = vmatpush1.msra.mxu1 %v1074_v37  ;;  %v1086_v40 = vand.u32 4294901760, %v1085_v61  ;;  %v5325_v31 = vand.u32 4294901760, %v3925_v28  ;;  %v785_v37 = vld [vmem:[#allocation2 + $0x1f0] sm:$0xff] }
  0x67   :  { %5600 = vst [vmem:[#allocation20_spill] sm:$0xff] %v3894_v54  ;;  %v5312_v38 = vand.u32 4294901760, %v3894_v54  ;;  %852 = vmatprep.subr.mxu0 %v3904_v4  ;;  %v1080_v53 = vand.u32 4294901760, %v1079_v50  ;;  %v3934_v50 = vand.u32 4294901760, %v725_v18  ;;  %v786_v4 = vld [vmem:[#allocation2 + $0x1f8] sm:$0xff]  ;;  %v3940_v59 = vand.u32 4294901760, %v724_v48 }
  0x68   :  { %5606 = vst [vmem:[#allocation26_spill] sm:$0xff] %v3927_v33  ;;  %854 = vmatpush1.msra.mxu0 %v3911_v11  ;;  %v1097_v56 = vsub.f32 %v3902_v5, %v5317_v62  ;;  %v1103_v62 = vsub.f32 %v3918_v7, %v5320_v46  ;;  %v784_v46 = vld [vmem:[#allocation2 + $0x1e8] sm:$0xff] }
  0x69   :  { %v1091_v16 = vsub.f32 %v3894_v54, %v5312_v38  ;;  %5607 = vst [vmem:[#allocation27_spill] sm:$0xff] %v3934_v50  ;;  %1081 = vmatprep.subr.mxu1 %v1080_v53  ;;  %v3938_v54 = vsub.f32 %v726_v42, %v3927_v33  ;;  %5609 = vst [vmem:[#allocation29_spill] sm:$0xff] %v3940_v59  ;;  %856 = vmatprep.subr.mxu0 %v3927_v33  ;;  %v3949_v53 = vand.u32 4294901760, %v723_v13 }
  0x6a   :  { %1087 = vmatpush1.msra.mxu1 %v1086_v40  ;;  %v1098_v61 = vand.u32 4294901760, %v1097_v56  ;;  %v3947_v5 = vsub.f32 %v725_v18, %v3934_v50  ;;  %858 = vmatpush1.msra.mxu0 %v3934_v50  ;;  %v1109_v42 = vsub.f32 %v3925_v28, %v5325_v31  ;;  %v3957_v56 = vsub.f32 %v724_v48, %v3940_v59  ;;  %v783_v31 = vld [vmem:[#allocation2 + $0x1e0] sm:$0xff] }
  0x6b   :  { %v1092_v38 = vand.u32 4294901760, %v1091_v16  ;;  %5608 = vst [vmem:[#allocation28_spill] sm:$0xff] %v3938_v54  ;;  %5611 = vst [vmem:[#allocation31_spill] sm:$0xff] %v3949_v53  ;;  %v3959_v40 = vand.u32 4294901760, %v786_v4  ;;  %860 = vmatprep.subr.mxu0 %v3940_v59  ;;  %v1104_v18 = vand.u32 4294901760, %v1103_v62  ;;  %v3966_v50 = vand.u32 4294901760, %v785_v37 }
  0x6c   :  { %5610 = vst [vmem:[#allocation30_spill] sm:$0xff] %v3947_v5  ;;  %5612 = vst [vmem:[#allocation32_spill] sm:$0xff] %v3957_v56  ;;  %v5336_v7 = vand.u32 4294901760, %v3947_v5  ;;  %862 = vmatpush1.msra.mxu0 %v3949_v53  ;;  %v1110_v16 = vand.u32 4294901760, %v1109_v42  ;;  %v5616_v48 = vand.u32 4294901760, %v3938_v54  ;;  %v5343_v33 = vand.u32 4294901760, %v3957_v56 }
  0x6d   :  { %1093 = vmatprep.subr.mxu1 %v1092_v38  ;;  %5613 = vst [vmem:[#allocation33_spill] sm:$0xff] %v3959_v40  ;;  %v3964_v38 = vsub.f32 %v723_v13, %v3949_v53  ;;  %5615 = vst [vmem:[#allocation35_spill] sm:$0xff] %v3966_v50  ;;  %864 = vmatprep.subr.mxu0 %v3959_v40  ;;  %v3982_v42 = vsub.f32 %v785_v37, %v3966_v50  ;;  %v3984_v53 = vand.u32 4294901760, %v784_v46 }
  0x6e   :  { %1099 = vmatpush1.msra.mxu1 %v1098_v61  ;;  %v1115_v28 = vsub.f32 %v3938_v54, %v5616_v48  ;;  %v3974_v61 = vsub.f32 %v786_v4, %v3959_v40  ;;  %v1121_v13 = vsub.f32 %v3947_v5, %v5336_v7  ;;  %v782_v48 = vld [vmem:[#allocation2 + $0x1d8] sm:$0xff]  ;;  %866 = vmatpush2.msra.mxu0 %v3966_v50  ;;  %v3991_v40 = vand.u32 4294901760, %v783_v31  ;;  %v781_v7 = vld [vmem:[#allocation2 + $0x1d0] sm:$0xff] }
  0x6f   :  { %5614 = vst [vmem:[#allocation34_spill] sm:$0xff] %v3964_v38  ;;  %1105 = vmatprep.subr.mxu1 %v1104_v18  ;;  %5618 = vst [vmem:[#allocation37_spill] sm:$0xff] %v3982_v42  ;;  %v1127_v18 = vsub.f32 %v3957_v56, %v5343_v33  ;;  %v5621_v37 = vand.u32 4294901760, %v3964_v38  ;;  %v5355_v59 = vand.u32 4294901760, %v3982_v42  ;;  %v3998_v50 = vsub.f32 %v784_v46, %v3984_v53 }
  0x70   :  { %5617 = vst [vmem:[#allocation36_spill] sm:$0xff] %v3974_v61  ;;  %5619 = vst [vmem:[#allocation38_spill] sm:$0xff] %v3984_v53  ;;  %1111 = vmatpush1.msra.mxu1 %v1110_v16  ;;  %v1116_v4 = vand.u32 4294901760, %v1115_v28  ;;  %v5350_v54 = vand.u32 4294901760, %v3974_v61  ;;  %v1122_v62 = vand.u32 4294901760, %v1121_v13  ;;  %v780_v28 = vld [vmem:[#allocation2 + $0x1c8] sm:$0xff]  ;;  %868 = vmatprep.subr.mxu0 %v3984_v53  ;;  %v4005_v13 = vsub.f32 %v783_v31, %v3991_v40 }
  0x71   :  { %5620 = vst [vmem:[#allocation39_spill] sm:$0xff] %v3991_v40  ;;  %v1133_v5 = vsub.f32 %v3964_v38, %v5621_v37  ;;  %5622 = vst [vmem:[#allocation40_spill] sm:$0xff] %v3998_v50  ;;  %v1128_v16 = vand.u32 4294901760, %v1127_v18  ;;  %v4007_v56 = vand.u32 4294901760, %v782_v48  ;;  %v779_v37 = vld [vmem:[#allocation2 + $0x1c0] sm:$0xff]  ;;  %870 = vmatpush2.msra.mxu0 %v3991_v40  ;;  %v1145_v38 = vsub.f32 %v3982_v42, %v5355_v59  ;;  %v778_v53 = vld [vmem:[#allocation2 + $0x1b8] sm:$0xff] }
  0x72   :  { %1117 = vmatprep.subr.mxu1 %v1116_v4  ;;  %v1139_v33 = vsub.f32 %v3974_v61, %v5350_v54  ;;  %5623 = vst [vmem:[#allocation41_spill] sm:$0xff] %v4005_v13  ;;  %v5358_v4 = vand.u32 4294901760, %v3998_v50  ;;  %v4014_v18 = vand.u32 4294901760, %v781_v7  ;;  %v5363_v31 = vand.u32 4294901760, %v4005_v13 }
  0x73   :  { %5624 = vst [vmem:[#allocation42_spill] sm:$0xff] %v4007_v56  ;;  %1123 = vmatpush1.msra.mxu1 %v1122_v62  ;;  %v1134_v46 = vand.u32 4294901760, %v1133_v5  ;;  %v4018_v61 = vsub.f32 %v782_v48, %v4007_v56  ;;  %v4020_v11 = vand.u32 4294901760, %v780_v28  ;;  %v777_v62 = vld [vmem:[#allocation2 + $0x1b0] sm:$0xff]  ;;  %872 = vmatprep.subr.mxu0 %v4007_v56  ;;  %v1146_v5 = vand.u32 4294901760, %v1145_v38 }
  0x74   :  { %5625 = vst [vmem:[#allocation43_spill] sm:$0xff] %v4014_v18  ;;  %1129 = vmatprep.subr.mxu1 %v1128_v16  ;;  %v1140_v54 = vand.u32 4294901760, %v1139_v33  ;;  %v1151_v59 = vsub.f32 %v3998_v50, %v5358_v4  ;;  %v4027_v42 = vsub.f32 %v781_v7, %v4014_v18  ;;  %v4029_v33 = vand.u32 4294901760, %v779_v37  ;;  %874 = vmatpush2.msra.mxu0 %v4014_v18  ;;  %v776_v4 = vld [vmem:[#allocation2 + $0x1a8] sm:$0xff] }
  0x75   :  { %5626 = vst [vmem:[#allocation44_spill] sm:$0xff] %v4018_v61  ;;  %5627 = vst [vmem:[#allocation45_spill] sm:$0xff] %v4020_v11  ;;  %1135 = vmatpush1.msra.mxu1 %v1134_v46  ;;  %v1157_v48 = vsub.f32 %v4005_v13, %v5363_v31  ;;  %v4037_v38 = vsub.f32 %v780_v28, %v4020_v11  ;;  %v4039_v46 = vand.u32 4294901760, %v778_v53  ;;  %876 = vmatprep.subr.mxu0 %v4020_v11  ;;  %v775_v31 = vld [vmem:[#allocation2 + $0x1a0] sm:$0xff] }
  0x76   :  { %5628 = vst [vmem:[#allocation46_spill] sm:$0xff] %v4027_v42  ;;  %5629 = vst [vmem:[#allocation47_spill] sm:$0xff] %v4029_v33  ;;  %1141 = vmatprep.subr.mxu1 %v1140_v54  ;;  %v1152_v7 = vand.u32 4294901760, %v1151_v59  ;;  %v5374_v50 = vand.u32 4294901760, %v4027_v42  ;;  %v4044_v54 = vsub.f32 %v779_v37, %v4029_v33  ;;  %v4046_v18 = vand.u32 4294901760, %v777_v62  ;;  %878 = vmatpush2.msra.mxu0 %v4029_v33 }
  0x77   :  { %5630 = vst [vmem:[#allocation48_spill] sm:$0xff] %v4037_v38  ;;  %5631 = vst [vmem:[#allocation49_spill] sm:$0xff] %v4039_v46  ;;  %1147 = vmatpush2.msra.mxu1 %v1146_v5  ;;  %v1158_v16 = vand.u32 4294901760, %v1157_v48  ;;  %v5634_v28 = vand.u32 4294901760, %v4018_v61  ;;  %v5381_v56 = vand.u32 4294901760, %v4037_v38  ;;  %v4054_v5 = vsub.f32 %v778_v53, %v4039_v46  ;;  %880 = vmatprep.subr.mxu0 %v4039_v46 }
  0x78   :  { %5632 = vst [vmem:[#allocation50_spill] sm:$0xff] %v4044_v54  ;;  %5633 = vst [vmem:[#allocation51_spill] sm:$0xff] %v4046_v18  ;;  %1153 = vmatprep.subr.mxu1 %v1152_v7  ;;  %v1169_v59 = vsub.f32 %v4027_v42, %v5374_v50  ;;  %v4062_v48 = vsub.f32 %v777_v62, %v4046_v18  ;;  %v4064_v33 = vand.u32 4294901760, %v776_v4  ;;  %882 = vmatpush2.msra.mxu0 %v4046_v18  ;;  %v773_v50 = vld [vmem:[#allocation2 + $0x190] sm:$0xff] }
  0x79   :  { %v1163_v13 = vsub.f32 %v4018_v61, %v5634_v28  ;;  %5635 = vst [vmem:[#allocation52_spill] sm:$0xff] %v4054_v5  ;;  %v774_v28 = vld [vmem:[#allocation2 + $0x198] sm:$0xff]  ;;  %1159 = vmatpush2.msra.mxu1 %v1158_v16  ;;  %v1175_v7 = vsub.f32 %v4037_v38, %v5381_v56  ;;  %v5388_v61 = vand.u32 4294901760, %v4054_v5  ;;  %v4071_v46 = vand.u32 4294901760, %v775_v31 }
  0x7a   :  { %5636 = vst [vmem:[#allocation53_spill] sm:$0xff] %v4062_v48  ;;  %5637 = vst [vmem:[#allocation54_spill] sm:$0xff] %v4064_v33  ;;  %v1170_v37 = vand.u32 4294901760, %v1169_v59  ;;  %v5639_v62 = vand.u32 4294901760, %v4044_v54  ;;  %v5393_v11 = vand.u32 4294901760, %v4062_v48  ;;  %v4078_v18 = vsub.f32 %v776_v4, %v4064_v33  ;;  %884 = vmatprep.subr.mxu0 %v4064_v33  ;;  %v770_v33 = vld [vmem:[#allocation2 + $0x178] sm:$0xff] }
  0x7b   :  { %v1164_v53 = vand.u32 4294901760, %v1163_v13  ;;  %5638 = vst [vmem:[#allocation55_spill] sm:$0xff] %v4071_v46  ;;  %v772_v13 = vld [vmem:[#allocation2 + $0x188] sm:$0xff]  ;;  %v1176_v16 = vand.u32 4294901760, %v1175_v7  ;;  %v1187_v56 = vsub.f32 %v4054_v5, %v5388_v61  ;;  %v4085_v59 = vsub.f32 %v775_v31, %v4071_v46  ;;  %886 = vmatpush2.msra.mxu0 %v4071_v46 }
  0x7c   :  { %v1181_v42 = vsub.f32 %v4044_v54, %v5639_v62  ;;  %5640 = vst [vmem:[#allocation56_spill] sm:$0xff] %v4078_v18  ;;  %v4087_v38 = vand.u32 4294901760, %v774_v28  ;;  %v771_v62 = vld [vmem:[#allocation2 + $0x180] sm:$0xff]  ;;  %v1193_v54 = vsub.f32 %v4062_v48, %v5393_v11  ;;  %v4094_v7 = vand.u32 4294901760, %v773_v50 }
  0x7d   :  { %1165 = vmatprep.subr.mxu1 %v1164_v53  ;;  %5641 = vst [vmem:[#allocation57_spill] sm:$0xff] %v4085_v59  ;;  %v5396_v53 = vand.u32 4294901760, %v4078_v18  ;;  %v1188_v61 = vand.u32 4294901760, %v1187_v56  ;;  %v5401_v31 = vand.u32 4294901760, %v4085_v59  ;;  %v4100_v40 = vand.u32 4294901760, %v772_v13 }
  0x7e   :  { %5642 = vst [vmem:[#allocation58_spill] sm:$0xff] %v4087_v38  ;;  %1171 = vmatpush2.msra.mxu1 %v1170_v37  ;;  %v1182_v4 = vand.u32 4294901760, %v1181_v42  ;;  %5643 = vst [vmem:[#allocation59_spill] sm:$0xff] %v4094_v7  ;;  %v4098_v5 = vsub.f32 %v774_v28, %v4087_v38  ;;  %v769_v37 = vld [vmem:[#allocation2 + $0x170] sm:$0xff]  ;;  %888 = vmatprep.subr.mxu0 %v4087_v38  ;;  %v1194_v42 = vand.u32 4294901760, %v1193_v54  ;;  %v4109_v56 = vand.u32 4294901760, %v771_v62 }
  0x7f   :  { %1177 = vmatprep.subr.mxu1 %v1176_v16  ;;  %5645 = vst [vmem:[#allocation61_spill] sm:$0xff] %v4100_v40  ;;  %v1199_v11 = vsub.f32 %v4078_v18, %v5396_v53  ;;  %v4107_v48 = vsub.f32 %v773_v50, %v4094_v7  ;;  %890 = vmatpush2.msra.mxu0 %v4094_v7  ;;  %v768_v53 = vld [vmem:[#allocation2 + $0x168] sm:$0xff]  ;;  %v4126_v7 = vand.u32 4294901760, %v769_v37 }
  0x80   :  { %5644 = vst [vmem:[#allocation60_spill] sm:$0xff] %v4098_v5  ;;  %1183 = vmatpush2.msra.mxu1 %v1182_v4  ;;  %5647 = vst [vmem:[#allocation63_spill] sm:$0xff] %v4109_v56  ;;  %v1205_v28 = vsub.f32 %v4085_v59, %v5401_v31  ;;  %v4117_v54 = vsub.f32 %v772_v13, %v4100_v40  ;;  %v4119_v4 = vand.u32 4294901760, %v770_v33  ;;  %892 = vmatprep.subr.mxu0 %v4100_v40  ;;  %v767_v31 = vld [vmem:[#allocation2 + $0x160] sm:$0xff] }
  0x81   :  { %5646 = vst [vmem:[#allocation62_spill] sm:$0xff] %v4107_v48  ;;  %1189 = vmatprep.subr.mxu1 %v1188_v61  ;;  %v1200_v50 = vand.u32 4294901760, %v1199_v11  ;;  %v5412_v18 = vand.u32 4294901760, %v4107_v48  ;;  %v4124_v61 = vsub.f32 %v771_v62, %v4109_v56  ;;  %5651 = vst [vmem:[#allocation67_spill] sm:$0xff] %v4126_v7  ;;  %894 = vmatpush2.msra.mxu0 %v4109_v56  ;;  %v5652_v13 = vand.u32 4294901760, %v4098_v5 }
  0x82   :  { %5648 = vst [vmem:[#allocation64_spill] sm:$0xff] %v4117_v54  ;;  %5649 = vst [vmem:[#allocation65_spill] sm:$0xff] %v4119_v4  ;;  %1195 = vmatpush2.msra.mxu1 %v1194_v42  ;;  %v1206_v16 = vand.u32 4294901760, %v1205_v28  ;;  %v5419_v38 = vand.u32 4294901760, %v4117_v54  ;;  %v4134_v42 = vsub.f32 %v770_v33, %v4119_v4  ;;  %896 = vmatprep.subr.mxu0 %v4119_v4  ;;  %v4144_v56 = vand.u32 4294901760, %v768_v53 }
  0x83   :  { %5650 = vst [vmem:[#allocation66_spill] sm:$0xff] %v4124_v61  ;;  %v1211_v59 = vsub.f32 %v4098_v5, %v5652_v13  ;;  %1201 = vmatprep.subr.mxu1 %v1200_v50  ;;  %v1217_v11 = vsub.f32 %v4107_v48, %v5412_v18  ;;  %v4142_v28 = vsub.f32 %v769_v37, %v4126_v7  ;;  %v766_v13 = vld [vmem:[#allocation2 + $0x158] sm:$0xff]  ;;  %v4151_v4 = vand.u32 4294901760, %v767_v31  ;;  %v765_v18 = vld [vmem:[#allocation2 + $0x150] sm:$0xff] }
  0x84   :  { %5653 = vst [vmem:[#allocation68_spill] sm:$0xff] %v4134_v42  ;;  %5655 = vst [vmem:[#allocation70_spill] sm:$0xff] %v4144_v56  ;;  %898 = vmatpush2.msra.mxu0 %v4126_v7  ;;  %1207 = vmatpush2.msra.mxu1 %v1206_v16  ;;  %v1223_v50 = vsub.f32 %v4117_v54, %v5419_v38  ;;  %v5426_v5 = vand.u32 4294901760, %v4134_v42  ;;  %v5657_v37 = vand.u32 4294901760, %v4124_v61  ;;  %v4167_v54 = vand.u32 4294901760, %v766_v13 }
  0x85   :  { %5654 = vst [vmem:[#allocation69_spill] sm:$0xff] %v4142_v28  ;;  %v1212_v33 = vand.u32 4294901760, %v1211_v59  ;;  %5656 = vst [vmem:[#allocation71_spill] sm:$0xff] %v4151_v4  ;;  %v1218_v62 = vand.u32 4294901760, %v1217_v11  ;;  %v5431_v40 = vand.u32 4294901760, %v4142_v28  ;;  %v4158_v7 = vsub.f32 %v768_v53, %v4144_v56  ;;  %v764_v59 = vld [vmem:[#allocation2 + $0x148] sm:$0xff]  ;;  %900 = vmatprep.subr.mxu0 %v4144_v56 }
  0x86   :  { %v1229_v48 = vsub.f32 %v4124_v61, %v5657_v37  ;;  %v1224_v16 = vand.u32 4294901760, %v1223_v50  ;;  %v1235_v38 = vsub.f32 %v4134_v42, %v5426_v5  ;;  %v4165_v11 = vsub.f32 %v767_v31, %v4151_v4  ;;  %5660 = vst [vmem:[#allocation74_spill] sm:$0xff] %v4167_v54  ;;  %v763_v37 = vld [vmem:[#allocation2 + $0x140] sm:$0xff]  ;;  %902 = vmatpush2.msra.mxu0 %v4151_v4  ;;  %v762_v56 = vld [vmem:[#allocation2 + $0x138] sm:$0xff] }
  0x87   :  { %5658 = vst [vmem:[#allocation72_spill] sm:$0xff] %v4158_v7  ;;  %1213 = vmatprep.subr.mxu1 %v1212_v33  ;;  %v1241_v61 = vsub.f32 %v4142_v28, %v5431_v40  ;;  %v5434_v33 = vand.u32 4294901760, %v4158_v7  ;;  %v4174_v50 = vand.u32 4294901760, %v765_v18  ;;  %v4178_v42 = vsub.f32 %v766_v13, %v4167_v54  ;;  %904 = vmatprep.subr.mxu0 %v4167_v54 }
  0x88   :  { %5659 = vst [vmem:[#allocation73_spill] sm:$0xff] %v4165_v11  ;;  %1219 = vmatpush2.msra.mxu1 %v1218_v62  ;;  %v1230_v53 = vand.u32 4294901760, %v1229_v48  ;;  %v1236_v5 = vand.u32 4294901760, %v1235_v38  ;;  %v5439_v31 = vand.u32 4294901760, %v4165_v11  ;;  %v4180_v46 = vand.u32 4294901760, %v764_v59  ;;  %v761_v62 = vld [vmem:[#allocation2 + $0x130] sm:$0xff] }
  0x89   :  { %5661 = vst [vmem:[#allocation75_spill] sm:$0xff] %v4174_v50  ;;  %1225 = vmatprep.subr.mxu1 %v1224_v16  ;;  %5662 = vst [vmem:[#allocation76_spill] sm:$0xff] %v4178_v42  ;;  %v1242_v48 = vand.u32 4294901760, %v1241_v61  ;;  %v1247_v40 = vsub.f32 %v4158_v7, %v5434_v33  ;;  %v4187_v28 = vsub.f32 %v765_v18, %v4174_v50  ;;  %v4189_v38 = vand.u32 4294901760, %v763_v37  ;;  %v760_v33 = vld [vmem:[#allocation2 + $0x128] sm:$0xff] }
  0x8a   :  { %5663 = vst [vmem:[#allocation77_spill] sm:$0xff] %v4180_v46  ;;  %1231 = vmatpush2.msra.mxu1 %v1230_v53  ;;  %906 = vmatpush2.msra.mxu0 %v4174_v50  ;;  %v1253_v13 = vsub.f32 %v4165_v11, %v5439_v31  ;;  %v4197_v61 = vsub.f32 %v764_v59, %v4180_v46  ;;  %v4199_v53 = vand.u32 4294901760, %v762_v56  ;;  %v4206_v50 = vand.u32 4294901760, %v761_v62  ;;  %v759_v31 = vld [vmem:[#allocation2 + $0x120] sm:$0xff] }
  0x8b   :  { %5664 = vst [vmem:[#allocation78_spill] sm:$0xff] %v4187_v28  ;;  %5665 = vst [vmem:[#allocation79_spill] sm:$0xff] %v4189_v38  ;;  %1237 = vmatprep.subr.mxu1 %v1236_v5  ;;  %908 = vmatprep.subr.mxu0 %v4180_v46  ;;  %v1248_v18 = vand.u32 4294901760, %v1247_v40  ;;  %v5450_v7 = vand.u32 4294901760, %v4187_v28  ;;  %v4204_v5 = vsub.f32 %v763_v37, %v4189_v38  ;;  %v5670_v59 = vand.u32 4294901760, %v4178_v42 }
  0x8c   :  { %5666 = vst [vmem:[#allocation80_spill] sm:$0xff] %v4197_v61  ;;  %5667 = vst [vmem:[#allocation81_spill] sm:$0xff] %v4199_v53  ;;  %1243 = vmatpush2.msra.mxu1 %v1242_v48  ;;  %910 = vmatpush2.msra.mxu0 %v4189_v38  ;;  %v1254_v16 = vand.u32 4294901760, %v1253_v13  ;;  %v5457_v54 = vand.u32 4294901760, %v4197_v61  ;;  %v4214_v48 = vsub.f32 %v762_v56, %v4199_v53  ;;  %v4224_v38 = vand.u32 4294901760, %v760_v33 }
  0x8d   :  { %5668 = vst [vmem:[#allocation82_spill] sm:$0xff] %v4204_v5  ;;  %5669 = vst [vmem:[#allocation83_spill] sm:$0xff] %v4206_v50  ;;  %v1259_v11 = vsub.f32 %v4178_v42, %v5670_v59  ;;  %912 = vmatprep.subr.mxu0 %v4199_v53  ;;  %1249 = vmatprep.subr.mxu1 %v1248_v18  ;;  %v1265_v40 = vsub.f32 %v4187_v28, %v5450_v7  ;;  %v758_v59 = vld [vmem:[#allocation2 + $0x118] sm:$0xff]  ;;  %v4231_v53 = vand.u32 4294901760, %v759_v31  ;;  %v757_v7 = vld [vmem:[#allocation2 + $0x110] sm:$0xff] }
  0x8e   :  { %5671 = vst [vmem:[#allocation84_spill] sm:$0xff] %v4214_v48  ;;  %v4222_v13 = vsub.f32 %v761_v62, %v4206_v50  ;;  %5673 = vst [vmem:[#allocation86_spill] sm:$0xff] %v4224_v38  ;;  %914 = vmatpush2.msra.mxu0 %v4206_v50  ;;  %1255 = vmatpush2.msra.mxu1 %v1254_v16  ;;  %v1271_v18 = vsub.f32 %v4197_v61, %v5457_v54  ;;  %v5462_v42 = vand.u32 4294901760, %v4214_v48 }
  0x8f   :  { %v1260_v56 = vand.u32 4294901760, %v1259_v11  ;;  %5674 = vst [vmem:[#allocation87_spill] sm:$0xff] %v4231_v53  ;;  %v1266_v37 = vand.u32 4294901760, %v1265_v40  ;;  %v5675_v62 = vand.u32 4294901760, %v4204_v5  ;;  %v4238_v50 = vsub.f32 %v760_v33, %v4224_v38  ;;  %v756_v11 = vld [vmem:[#allocation2 + $0x108] sm:$0xff]  ;;  %916 = vmatprep.subr.mxu0 %v4224_v38 }
  0x90   :  { %5672 = vst [vmem:[#allocation85_spill] sm:$0xff] %v4222_v13  ;;  %v5467_v46 = vand.u32 4294901760, %v4222_v13  ;;  %v1272_v16 = vand.u32 4294901760, %v1271_v18  ;;  %v1283_v54 = vsub.f32 %v4214_v48, %v5462_v42  ;;  %v4245_v40 = vsub.f32 %v759_v31, %v4231_v53  ;;  %918 = vmatpush2.msra.mxu0 %v4231_v53 }
  0x91   :  { %v1277_v28 = vsub.f32 %v4204_v5, %v5675_v62  ;;  %5676 = vst [vmem:[#allocation88_spill] sm:$0xff] %v4238_v50  ;;  %1261 = vmatprep.subr.mxu1 %v1260_v56  ;;  %v4247_v61 = vand.u32 4294901760, %v758_v59  ;;  %v755_v62 = vld [vmem:[#allocation2 + $0x100] sm:$0xff]  ;;  %v5468_v56 = vand.u32 4294901760, %v4238_v50  ;;  %v4254_v18 = vand.u32 4294901760, %v757_v7 }
  0x92   :  { %5677 = vst [vmem:[#allocation89_spill] sm:$0xff] %v4245_v40  ;;  %1267 = vmatpush2.msra.mxu1 %v1266_v37  ;;  %v1289_v5 = vsub.f32 %v4222_v13, %v5467_v46  ;;  %v1284_v42 = vand.u32 4294901760, %v1283_v54  ;;  %v5469_v31 = vand.u32 4294901760, %v4245_v40  ;;  %v4260_v38 = vand.u32 4294901760, %v756_v11 }
  0x93   :  { %5678 = vst [vmem:[#allocation90_spill] sm:$0xff] %v4247_v61  ;;  %v1278_v33 = vand.u32 4294901760, %v1277_v28  ;;  %5679 = vst [vmem:[#allocation91_spill] sm:$0xff] %v4254_v18  ;;  %1273 = vmatprep.subr.mxu1 %v1272_v16  ;;  %v4258_v48 = vsub.f32 %v758_v59, %v4247_v61  ;;  %920 = vmatprep.subr.mxu0 %v4247_v61  ;;  %v1295_v37 = vsub.f32 %v4238_v50, %v5468_v56 }
  0x94   :  { %5681 = vst [vmem:[#allocation93_spill] sm:$0xff] %v4260_v38  ;;  %v1290_v28 = vand.u32 4294901760, %v1289_v5  ;;  %v4267_v46 = vsub.f32 %v757_v7, %v4254_v18  ;;  %v4269_v16 = vand.u32 4294901760, %v755_v62  ;;  %922 = vmatpush2.msra.mxu0 %v4254_v18  ;;  %v1301_v54 = vsub.f32 %v4245_v40, %v5469_v31 }
  0x95   :  { %5680 = vst [vmem:[#allocation92_spill] sm:$0xff] %v4258_v48  ;;  %1279 = vmatpush2.msra.mxu1 %v1278_v33  ;;  %v5472_v59 = vand.u32 4294901760, %v4258_v48  ;;  %v4277_v5 = vsub.f32 %v756_v11, %v4260_v38  ;;  %924 = vmatprep.subr.mxu0 %v4260_v38  ;;  %v1296_v33 = vand.u32 4294901760, %v1295_v37 }
  0x96   :  { %5682 = vst [vmem:[#allocation94_spill] sm:$0xff] %v4267_v46  ;;  %5683 = vst [vmem:[#allocation95_spill] sm:$0xff] %v4269_v16  ;;  %1285 = vmatprep.subr.mxu1 %v1284_v42  ;;  %v5474_v7 = vand.u32 4294901760, %v4267_v46  ;;  %v4282_v56 = vsub.f32 %v755_v62, %v4269_v16  ;;  %926 = vmatpush2.msra.mxu0 %v4269_v16  ;;  %v1302_v42 = vand.u32 4294901760, %v1301_v54 }
  0x97   :  { %5684 = vst [vmem:[#allocation96_spill] sm:$0xff] %v4277_v5  ;;  %1291 = vmatpush2.msra.mxu1 %v1290_v28  ;;  %v1307_v31 = vsub.f32 %v4258_v48, %v5472_v59  ;;  %v5475_v40 = vand.u32 4294901760, %v4277_v5  ;;  %1339 = vmatprep.subr.mxu0 %v3612_v26 }
  0x98   :  { %5685 = vst [vmem:[#allocation97_spill] sm:$0xff] %v4282_v56  ;;  %1297 = vmatprep.subr.mxu1 %v1296_v33  ;;  %v1313_v11 = vsub.f32 %v4267_v46, %v5474_v7  ;;  %v5476_v28 = vand.u32 4294901760, %v4282_v56  ;;  %v60_v7 = vlaneseq }
  0x99   :  { %1303 = vmatpush2.msra.mxu1 %v1302_v42  ;;  %v1308_v62 = vand.u32 4294901760, %v1307_v31  ;;  %v1319_v37 = vsub.f32 %v4277_v5, %v5475_v40 }
  0x9a   :  { %v1314_v54 = vand.u32 4294901760, %v1313_v11  ;;  %v1325_v59 = vsub.f32 %v4282_v56, %v5476_v28  ;;  %v4301_v42 = vshrl.u32 %v60_v7, 7  ;;  %v58_v11 = vld [vmem:[%s5264_s2] sm:$0x3] }
  0x9b   :  { %1309 = vmatprep.subr.mxu1 %v1308_v62  ;;  %v1320_v26 = vand.u32 4294901760, %v1319_v37 }
  0x9c   :  { %1315 = vmatpush2.msra.mxu1 %v1314_v54  ;;  %v1326_v33 = vand.u32 4294901760, %v1325_v59  ;;  %5686 = vst [vmem:[#allocation98_spill] sm:$0xff] %v4301_v42  ;;  %v5498_v31 = vsub.s32 0, %v4301_v42  ;;  %v5507_v28 = vsub.s32 1, %v4301_v42 }
  0x9d   :  { %1321 = vmatprep.subr.mxu1 %v1320_v26 }
  0x9e   :  { %1327 = vmatpush2.msra.mxu1 %v1326_v33  ;;  %v63_v62 = vrot.slane %v58_v11, %v5498_v31  ;;  %v67_v37 = vrot.slane %v58_v11, %v5507_v28 }
  0x9f   :  { %1541 = vmatprep.subr.mxu1 %v3593_v8 }
  0xe5   :  { %v161_v40 = vpop.f32.mrf.mxu0 }
  0xe6   :  { %v162_v7 = vadd.f32 %v161_v40, %v63_v62 }
  0xe7   :  { %v163_v59 = vpop.f32.mrf.mxu0 }
  0xe8   :  { %v164_v56 = vadd.f32 %v163_v59, %v67_v37  ;;  %v5697_v37 = vld [vmem:[#allocation26_spill] sm:$0xff] }
  0xeb   :  { %v313_v26 = vpop.f32.mrf.mxu1 }
  0xec   :  { %v314_v48 = vadd.f32 %v313_v26, %v162_v7  ;;  %v5699_v7 = vld [vmem:[#allocation27_spill] sm:$0xff] }
  0xed   :  { %v315_v33 = vpop.f32.mrf.mxu1 }
  0xee   :  { %v316_v13 = vadd.f32 %v315_v33, %v164_v56  ;;  %v5700_v33 = vld [vmem:[#allocation16_spill] sm:$0xff] }
  0xf5   :  { %v418_v54 = vpop.f32.mrf.mxu0 }
  0xf6   :  { %v419_v8 = vadd.f32 %v418_v54, %v314_v48  ;;  %v5698_v54 = vld [vmem:[#allocation15_spill] sm:$0xff] }
  0xf7   :  { %v420_v5 = vpop.f32.mrf.mxu0 }
  0xf8   :  { %v421_v38 = vadd.f32 %v420_v5, %v316_v13  ;;  %v5690_v13 = vld [vmem:[#allocation11_spill] sm:$0xff]  ;;  %v5693_v5 = vld [vmem:[#allocation22_spill] sm:$0xff] }
  0xfd   :  { %v508_v46 = vpop.f32.mrf.mxu1 }
  0xfe   :  { %v509_v18 = vadd.f32 %v508_v46, %v419_v8 }
  0xff   :  { %v510_v16 = vpop.f32.mrf.mxu1 }
 0x100   :  { %v511_v31 = vadd.f32 %v510_v16, %v421_v38  ;;  %v5692_v16 = vld [vmem:[#allocation12_spill] sm:$0xff] }
 0x106   :  { %v628_v50 = vpop.f32.mrf.mxu0 }
 0x107   :  { %v629_v53 = vadd.f32 %v628_v50, %v509_v18  ;;  %v5691_v18 = vld [vmem:[#allocation19_spill] sm:$0xff] }
 0x108   :  { %v630_v61 = vpop.f32.mrf.mxu0 }
 0x109   :  { %v631_v25 = vadd.f32 %v630_v61, %v511_v31  ;;  %v5688_v61 = vld [vmem:[#allocation10_spill] sm:$0xff] }
 0x10a   :  { %v5696_v31 = vld [vmem:[#allocation14_spill] sm:$0xff] }
 0x10f   :  { %v716_v4 = vpop.f32.mrf.mxu1 }
 0x110   :  { %v717_v42 = vadd.f32 %v716_v4, %v629_v53  ;;  %v5689_v53 = vld [vmem:[#allocation17_spill] sm:$0xff] }
 0x111   :  { %v718_v11 = vpop.f32.mrf.mxu1 }
 0x112   :  { %v721_v28 = vmax.f32 %v717_v42, 0.0  ;;  %v719_v40 = vadd.f32 %v718_v11, %v631_v25  ;;  %v5695_v42 = vld [vmem:[#allocation23_spill] sm:$0xff]  ;;  %v5701_v11 = vld [vmem:[#allocation29_spill] sm:$0xff] }
 0x114   :  { %v4312_v62 = vand.u32 4294901760, %v721_v28  ;;  %v722_v59 = vmax.f32 %v719_v40, 0.0  ;;  %v5702_v40 = vld [vmem:[#allocation18_spill] sm:$0xff] }
 0x116   :  { %5687 = vst [vmem:[#allocation99_spill] sm:$0xff] %v4312_v62  ;;  %v4315_v26 = vsub.f32 %v721_v28, %v4312_v62  ;;  %v4317_v56 = vand.u32 4294901760, %v722_v59  ;;  %v5694_v28 = vld [vmem:[#allocation13_spill] sm:$0xff] }
 0x118   :  { %v5508_v48 = vand.u32 4294901760, %v4315_v26  ;;  %v928_v8 = vsub.f32 %v722_v59, %v4317_v56  ;;  %1329 = vmatprep.mubr.f32.mxu1 %v4317_v56  ;;  %v5703_v59 = vld [vmem:[#allocation31_spill] sm:$0xff] }
 0x119   :  { %1331 = vmatmul.mubr.f32.vlgmr.msra.gmra.mxu1 %v4312_v62  ;;  %v5711_v62 = vld [vmem:[#allocation39_spill] sm:$0xff] }
 0x11a   :  { %1543 = vmatpush1.msra.mxu1 %v3598_v19  ;;  %v929_v46 = vand.u32 4294901760, %v928_v8  ;;  %v936_v25 = vsub.f32 %v4315_v26, %v5508_v48  ;;  %v5710_v48 = vld [vmem:[#allocation25_spill] sm:$0xff] }
 0x11b   :  { %1545 = vmatprep.subr.mxu1 %v3603_v24 }
 0x11c   :  { %1547 = vmatpush1.msra.mxu1 %v3614_v32  ;;  %1671 = vmatprep.mubr.f32.mxu1 %v929_v46  ;;  %v930_v4 = vsub.f32 %v928_v8, %v929_v46  ;;  %v937_v38 = vand.u32 4294901760, %v936_v25  ;;  %v5705_v46 = vld [vmem:[#allocation33_spill] sm:$0xff] }
 0x11d   :  { %1549 = vmatprep.subr.mxu1 %v3631_v41  ;;  %v5706_v25 = vld [vmem:[#allocation21_spill] sm:$0xff] }
 0x11e   :  { %1551 = vmatpush1.msra.mxu1 %v3644_v58  ;;  %v931_v50 = vand.u32 4294901760, %v930_v4  ;;  %v5707_v4 = vld [vmem:[#allocation35_spill] sm:$0xff] }
 0x11f   :  { %1553 = vmatprep.subr.mxu1 %v3650_v63 }
 0x120   :  { %1555 = vmatpush1.msra.mxu1 %v3658_v3  ;;  %932 = vmatprep.mubr.f32.mxu0 %v931_v50  ;;  %v5708_v50 = vld [vmem:[#allocation24_spill] sm:$0xff] }
 0x121   :  { %1557 = vmatprep.subr.mxu1 %v3669_v14  ;;  %938 = vmatmul.mubr.f32.vlgmr.msra.gmra.mxu0 %v937_v38  ;;  %v5709_v38 = vld [vmem:[#allocation38_spill] sm:$0xff] }
 0x122   :  { %1342 = vmatpush1.msra.mxu0 %v3619_v35  ;;  %1559 = vmatpush1.msra.mxu1 %v3682_v22 }
 0x123   :  { %1345 = vmatprep.subr.mxu0 %v3626_v36  ;;  %1531 = vmatprep.mubr.f32.mxu0 %v928_v8  ;;  %v5704_v8 = vld [vmem:[#allocation20_spill] sm:$0xff] }
 0x124   :  { %1561 = vmatprep.subr.mxu1 %v3695_v51  ;;  %1348 = vmatpush1.msra.mxu0 %v3638_v49 }
 0x125   :  { %1563 = vmatpush1.msra.mxu1 %v3703_v60  ;;  %1351 = vmatprep.subr.mxu0 %v3656_v6 }
 0x126   :  { %1565 = vmatprep.subr.mxu1 %v3716_v29  ;;  %1354 = vmatpush1.msra.mxu0 %v3680_v12 }
 0x127   :  { %1567 = vmatpush1.msra.mxu1 %v3725_v47  ;;  %1357 = vmatprep.subr.mxu0 %v3693_v44 }
 0x128   :  { %1569 = vmatprep.subr.mxu1 %v3734_v27  ;;  %1360 = vmatpush1.msra.mxu0 %v3701_v57 }
 0x129   :  { %1571 = vmatpush1.msra.mxu1 %v3745_v30  ;;  %1363 = vmatprep.subr.mxu0 %v3714_v20 }
 0x12a   :  { %1573 = vmatprep.subr.mxu1 %v3754_v55  ;;  %1366 = vmatpush1.msra.mxu0 %v3723_v0 }
 0x12b   :  { %1575 = vmatpush1.msra.mxu1 %v3765_v10  ;;  %1369 = vmatprep.subr.mxu0 %v3732_v23 }
 0x12c   :  { %1577 = vmatprep.subr.mxu1 %v3776_v43  ;;  %1372 = vmatpush1.msra.mxu0 %v3743_v1 }
 0x12d   :  { %1579 = vmatpush1.msra.mxu1 %v3787_v17  ;;  %1375 = vmatprep.subr.mxu0 %v3752_v45 }
 0x12e   :  { %1581 = vmatprep.subr.mxu1 %v3859_v21  ;;  %1378 = vmatpush1.msra.mxu0 %v3763_v9 }
 0x12f   :  { %1583 = vmatpush1.msra.mxu1 %v3861_v15  ;;  %1381 = vmatprep.subr.mxu0 %v3774_v39 }
 0x130   :  { %1585 = vmatprep.subr.mxu1 %v3866_v2  ;;  %1384 = vmatpush1.msra.mxu0 %v3785_v52 }
 0x131   :  { %1587 = vmatpush1.msra.mxu1 %v3872_v34  ;;  %1387 = vmatprep.subr.mxu0 %v5688_v61 }
 0x132   :  { %1589 = vmatprep.subr.mxu1 %v5689_v53  ;;  %1390 = vmatpush1.msra.mxu0 %v5690_v13 }
 0x133   :  { %1591 = vmatpush1.msra.mxu1 %v5691_v18  ;;  %1393 = vmatprep.subr.mxu0 %v5692_v16 }
 0x134   :  { %1593 = vmatprep.subr.mxu1 %v5693_v5  ;;  %1396 = vmatpush1.msra.mxu0 %v5694_v28 }
 0x135   :  { %1595 = vmatpush1.msra.mxu1 %v5695_v42  ;;  %1399 = vmatprep.subr.mxu0 %v5696_v31 }
 0x136   :  { %1597 = vmatprep.subr.mxu1 %v5697_v37  ;;  %1402 = vmatpush1.msra.mxu0 %v5698_v54 }
 0x137   :  { %1599 = vmatpush1.msra.mxu1 %v5699_v7  ;;  %1405 = vmatprep.subr.mxu0 %v5700_v33 }
 0x138   :  { %1601 = vmatprep.subr.mxu1 %v5701_v11  ;;  %1408 = vmatpush1.msra.mxu0 %v5702_v40  ;;  %v5712_v11 = vld [vmem:[#allocation28_spill] sm:$0xff]  ;;  %v5713_v40 = vld [vmem:[#allocation42_spill] sm:$0xff] }
 0x139   :  { %1603 = vmatpush1.msra.mxu1 %v5703_v59  ;;  %1411 = vmatprep.subr.mxu0 %v5704_v8  ;;  %v5714_v59 = vld [vmem:[#allocation30_spill] sm:$0xff]  ;;  %v5715_v8 = vld [vmem:[#allocation43_spill] sm:$0xff] }
 0x13a   :  { %1605 = vmatprep.subr.mxu1 %v5705_v46  ;;  %1414 = vmatpush1.msra.mxu0 %v5706_v25  ;;  %v5716_v46 = vld [vmem:[#allocation32_spill] sm:$0xff]  ;;  %v5717_v25 = vld [vmem:[#allocation45_spill] sm:$0xff] }
 0x13b   :  { %1607 = vmatpush2.msra.mxu1 %v5707_v4  ;;  %1417 = vmatprep.subr.mxu0 %v5708_v50  ;;  %v5718_v4 = vld [vmem:[#allocation34_spill] sm:$0xff]  ;;  %v5719_v50 = vld [vmem:[#allocation47_spill] sm:$0xff] }
 0x13c   :  { %1609 = vmatprep.subr.mxu1 %v5709_v38  ;;  %1420 = vmatpush1.msra.mxu0 %v5710_v48  ;;  %v5720_v38 = vld [vmem:[#allocation36_spill] sm:$0xff]  ;;  %v5721_v48 = vld [vmem:[#allocation49_spill] sm:$0xff] }
 0x13d   :  { %1611 = vmatpush2.msra.mxu1 %v5711_v62  ;;  %1423 = vmatprep.subr.mxu0 %v5712_v11  ;;  %v5722_v62 = vld [vmem:[#allocation37_spill] sm:$0xff]  ;;  %v5723_v11 = vld [vmem:[#allocation51_spill] sm:$0xff] }
 0x13e   :  { %1613 = vmatprep.subr.mxu1 %v5713_v40  ;;  %1426 = vmatpush1.msra.mxu0 %v5714_v59  ;;  %v5724_v40 = vld [vmem:[#allocation40_spill] sm:$0xff]  ;;  %v5725_v59 = vld [vmem:[#allocation54_spill] sm:$0xff] }
 0x13f   :  { %1615 = vmatpush2.msra.mxu1 %v5715_v8  ;;  %1429 = vmatprep.subr.mxu0 %v5716_v46  ;;  %v5726_v8 = vld [vmem:[#allocation41_spill] sm:$0xff]  ;;  %v5727_v46 = vld [vmem:[#allocation55_spill] sm:$0xff] }
 0x140   :  { %1617 = vmatprep.subr.mxu1 %v5717_v25  ;;  %1432 = vmatpush1.msra.mxu0 %v5718_v4  ;;  %v5728_v25 = vld [vmem:[#allocation44_spill] sm:$0xff]  ;;  %v5729_v4 = vld [vmem:[#allocation58_spill] sm:$0xff] }
 0x141   :  { %1619 = vmatpush2.msra.mxu1 %v5719_v50  ;;  %1435 = vmatprep.subr.mxu0 %v5720_v38  ;;  %v5730_v50 = vld [vmem:[#allocation46_spill] sm:$0xff]  ;;  %v5731_v38 = vld [vmem:[#allocation59_spill] sm:$0xff] }
 0x142   :  { %1621 = vmatprep.subr.mxu1 %v5721_v48  ;;  %1438 = vmatpush2.msra.mxu0 %v5722_v62  ;;  %v5732_v48 = vld [vmem:[#allocation48_spill] sm:$0xff]  ;;  %v5733_v62 = vld [vmem:[#allocation61_spill] sm:$0xff] }
 0x143   :  { %1623 = vmatpush2.msra.mxu1 %v5723_v11  ;;  %1441 = vmatprep.subr.mxu0 %v5724_v40  ;;  %v5734_v11 = vld [vmem:[#allocation50_spill] sm:$0xff]  ;;  %v5735_v40 = vld [vmem:[#allocation63_spill] sm:$0xff] }
 0x144   :  { %1625 = vmatprep.subr.mxu1 %v5725_v59  ;;  %1444 = vmatpush2.msra.mxu0 %v5726_v8  ;;  %v5736_v59 = vld [vmem:[#allocation52_spill] sm:$0xff]  ;;  %v5737_v8 = vld [vmem:[#allocation65_spill] sm:$0xff] }
 0x145   :  { %1627 = vmatpush2.msra.mxu1 %v5727_v46  ;;  %1447 = vmatprep.subr.mxu0 %v5728_v25  ;;  %v5738_v46 = vld [vmem:[#allocation53_spill] sm:$0xff]  ;;  %v5739_v25 = vld [vmem:[#allocation67_spill] sm:$0xff] }
 0x146   :  { %1629 = vmatprep.subr.mxu1 %v5729_v4  ;;  %1450 = vmatpush2.msra.mxu0 %v5730_v50  ;;  %v5740_v4 = vld [vmem:[#allocation56_spill] sm:$0xff]  ;;  %v5741_v50 = vld [vmem:[#allocation70_spill] sm:$0xff] }
 0x147   :  { %1631 = vmatpush2.msra.mxu1 %v5731_v38  ;;  %1453 = vmatprep.subr.mxu0 %v5732_v48  ;;  %v5742_v38 = vld [vmem:[#allocation57_spill] sm:$0xff]  ;;  %v5743_v48 = vld [vmem:[#allocation71_spill] sm:$0xff] }
 0x148   :  { %1633 = vmatprep.subr.mxu1 %v5733_v62  ;;  %1456 = vmatpush2.msra.mxu0 %v5734_v11  ;;  %v5744_v62 = vld [vmem:[#allocation60_spill] sm:$0xff]  ;;  %v5745_v11 = vld [vmem:[#allocation74_spill] sm:$0xff] }
 0x149   :  { %1635 = vmatpush2.msra.mxu1 %v5735_v40  ;;  %1459 = vmatprep.subr.mxu0 %v5736_v59  ;;  %v5746_v40 = vld [vmem:[#allocation62_spill] sm:$0xff]  ;;  %v5747_v59 = vld [vmem:[#allocation75_spill] sm:$0xff] }
 0x14a   :  { %1637 = vmatprep.subr.mxu1 %v5737_v8  ;;  %1462 = vmatpush2.msra.mxu0 %v5738_v46  ;;  %v5748_v8 = vld [vmem:[#allocation64_spill] sm:$0xff]  ;;  %v5749_v46 = vld [vmem:[#allocation77_spill] sm:$0xff] }
 0x14b   :  { %1639 = vmatpush2.msra.mxu1 %v5739_v25  ;;  %1465 = vmatprep.subr.mxu0 %v5740_v4  ;;  %v5750_v25 = vld [vmem:[#allocation66_spill] sm:$0xff]  ;;  %v5751_v4 = vld [vmem:[#allocation79_spill] sm:$0xff] }
 0x14c   :  { %1641 = vmatprep.subr.mxu1 %v5741_v50  ;;  %1468 = vmatpush2.msra.mxu0 %v5742_v38  ;;  %v5752_v50 = vld [vmem:[#allocation68_spill] sm:$0xff]  ;;  %v5753_v38 = vld [vmem:[#allocation81_spill] sm:$0xff] }
 0x14d   :  { %1643 = vmatpush2.msra.mxu1 %v5743_v48  ;;  %1471 = vmatprep.subr.mxu0 %v5744_v62  ;;  %v5754_v48 = vld [vmem:[#allocation69_spill] sm:$0xff]  ;;  %v5755_v62 = vld [vmem:[#allocation83_spill] sm:$0xff] }
 0x14e   :  { %1645 = vmatprep.subr.mxu1 %v5745_v11  ;;  %1474 = vmatpush2.msra.mxu0 %v5746_v40  ;;  %v5756_v11 = vld [vmem:[#allocation72_spill] sm:$0xff]  ;;  %v5757_v40 = vld [vmem:[#allocation86_spill] sm:$0xff] }
 0x14f   :  { %1647 = vmatpush2.msra.mxu1 %v5747_v59  ;;  %1477 = vmatprep.subr.mxu0 %v5748_v8  ;;  %v5758_v59 = vld [vmem:[#allocation73_spill] sm:$0xff]  ;;  %v5759_v8 = vld [vmem:[#allocation87_spill] sm:$0xff] }
 0x150   :  { %1649 = vmatprep.subr.mxu1 %v5749_v46  ;;  %1480 = vmatpush2.msra.mxu0 %v5750_v25  ;;  %v5760_v46 = vld [vmem:[#allocation76_spill] sm:$0xff]  ;;  %v5761_v25 = vld [vmem:[#allocation90_spill] sm:$0xff] }
 0x151   :  { %1651 = vmatpush2.msra.mxu1 %v5751_v4  ;;  %1483 = vmatprep.subr.mxu0 %v5752_v50  ;;  %v5762_v4 = vld [vmem:[#allocation78_spill] sm:$0xff]  ;;  %v5763_v50 = vld [vmem:[#allocation91_spill] sm:$0xff] }
 0x152   :  { %1653 = vmatprep.subr.mxu1 %v5753_v38  ;;  %1486 = vmatpush2.msra.mxu0 %v5754_v48  ;;  %v5764_v38 = vld [vmem:[#allocation80_spill] sm:$0xff]  ;;  %v5765_v48 = vld [vmem:[#allocation93_spill] sm:$0xff] }
 0x153   :  { %1655 = vmatpush2.msra.mxu1 %v5755_v62  ;;  %1489 = vmatprep.subr.mxu0 %v5756_v11  ;;  %v5766_v62 = vld [vmem:[#allocation82_spill] sm:$0xff]  ;;  %v5767_v11 = vld [vmem:[#allocation95_spill] sm:$0xff] }
 0x154   :  { %1657 = vmatprep.subr.mxu1 %v5757_v40  ;;  %1492 = vmatpush2.msra.mxu0 %v5758_v59  ;;  %v5768_v40 = vld [vmem:[#allocation84_spill] sm:$0xff] }
 0x155   :  { %1659 = vmatpush2.msra.mxu1 %v5759_v8  ;;  %1495 = vmatprep.subr.mxu0 %v5760_v46  ;;  %v5769_v8 = vand.u32 4294901760, %v4315_v26  ;;  %v5770_v46 = vld [vmem:[#allocation8_spill] sm:$0xff] }
 0x156   :  { %1661 = vmatprep.subr.mxu1 %v5761_v25  ;;  %1498 = vmatpush2.msra.mxu0 %v5762_v4  ;;  %v5771_v25 = vld [vmem:[#allocation85_spill] sm:$0xff] }
 0x157   :  { %1663 = vmatpush2.msra.mxu1 %v5763_v50  ;;  %1501 = vmatprep.subr.mxu0 %v5764_v38  ;;  %v5772_v38 = vld [vmem:[#allocation88_spill] sm:$0xff] }
 0x158   :  { %1665 = vmatprep.subr.mxu1 %v5765_v48  ;;  %1504 = vmatpush2.msra.mxu0 %v5766_v62  ;;  %v5773_v62 = vld [vmem:[#allocation89_spill] sm:$0xff] }
 0x159   :  { %1667 = vmatpush2.msra.mxu1 %v5767_v11  ;;  %1507 = vmatprep.subr.mxu0 %v5768_v40  ;;  %v5774_v40 = vld [vmem:[#allocation92_spill] sm:$0xff] }
 0x15a   :  { %1675 = vmatmul.mubr.f32.vlgmr.msra.gmra.mxu1 %v5769_v8  ;;  %1947 = vmatprep.subr.mxu1 %v5770_v46  ;;  %v5775_v8 = vld [vmem:[#allocation94_spill] sm:$0xff]  ;;  %v5776_v46 = vld [vmem:[#allocation96_spill] sm:$0xff] }
 0x15b   :  { %1510 = vmatpush2.msra.mxu0 %v5771_v25  ;;  %1949 = vmatpush1.msra.mxu1 %v3598_v19  ;;  %v5777_v19 = vld [vmem:[#allocation97_spill] sm:$0xff] }
 0x15c   :  { %2075 = vmatprep.mubr.f32.mxu1 %v4317_v56  ;;  %1513 = vmatprep.subr.mxu0 %v5772_v38 }
 0x15d   :  { %1951 = vmatprep.subr.mxu1 %v3603_v24  ;;  %1516 = vmatpush2.msra.mxu0 %v5773_v62  ;;  %v5778_v24 = vld [vmem:[#allocation9_spill] sm:$0xff] }
 0x15e   :  { %1953 = vmatpush1.msra.mxu1 %v3614_v32  ;;  %1519 = vmatprep.subr.mxu0 %v5774_v40  ;;  %v5779_v32 = vand.u32 4294901760, %v5778_v24  ;;  %v5830_v24 = vld [vmem:[#allocation36_spill] sm:$0xff] }
 0x15f   :  { %1955 = vmatprep.subr.mxu1 %v3631_v41  ;;  %1522 = vmatpush2.msra.mxu0 %v5775_v8  ;;  %v5780_v41 = vand.u32 4294901760, %v3619_v35  ;;  %v5784_v35 = vand.u32 4294901760, %v3680_v12  ;;  %v5789_v12 = vand.u32 4294901760, %v3732_v23  ;;  %v5799_v23 = vand.u32 4294901760, %v5696_v31 }
 0x160   :  { %1957 = vmatpush1.msra.mxu1 %v3644_v58  ;;  %1525 = vmatprep.subr.mxu0 %v5776_v46  ;;  %v5781_v58 = vand.u32 4294901760, %v3626_v36  ;;  %v5785_v36 = vand.u32 4294901760, %v3693_v44  ;;  %v5791_v44 = vand.u32 4294901760, %v3752_v45  ;;  %v5803_v45 = vld [vmem:[#allocation18_spill] sm:$0xff] }
 0x161   :  { %1959 = vmatprep.subr.mxu1 %v3650_v63  ;;  %1528 = vmatpush2.msra.mxu0 %v5777_v19  ;;  %v5782_v63 = vand.u32 4294901760, %v3638_v49  ;;  %v5786_v49 = vand.u32 4294901760, %v3701_v57  ;;  %v5793_v57 = vand.u32 4294901760, %v3774_v39 }
 0x162   :  { %1961 = vmatpush1.msra.mxu1 %v3658_v3  ;;  %1534 = vmatmul.mubr.f32.vlgmr.msra.gmra.mxu0 %v4315_v26  ;;  %v5783_v3 = vand.u32 4294901760, %v3656_v6  ;;  %v5787_v6 = vand.u32 4294901760, %v3714_v20  ;;  %v5795_v20 = vand.u32 4294901760, %v5688_v61  ;;  %v5815_v26 = vld [vmem:[#allocation25_spill] sm:$0xff]  ;;  %v5817_v61 = vld [vmem:[#allocation39_spill] sm:$0xff] }
 0x163   :  { %1684 = vmatprep.subr.mxu0 %v5779_v32  ;;  %1963 = vmatprep.subr.mxu1 %v3669_v14  ;;  %v5788_v14 = vand.u32 4294901760, %v3723_v0  ;;  %v5797_v0 = vand.u32 4294901760, %v5692_v16  ;;  %v5821_v16 = vld [vmem:[#allocation30_spill] sm:$0xff]  ;;  %v5831_v32 = vand.u32 4294901760, %v5830_v24 }
 0x164   :  { %1688 = vmatpush1.msra.mxu0 %v5780_v41  ;;  %1938 = vmatprep.mubr.f32.mxu0 %v4317_v56  ;;  %v5816_v56 = vand.u32 4294901760, %v5815_v26  ;;  %v5832_v41 = vld [vmem:[#allocation49_spill] sm:$0xff] }
 0x165   :  { %1965 = vmatpush1.msra.mxu1 %v3682_v22  ;;  %1692 = vmatprep.subr.mxu0 %v5781_v58  ;;  %v5790_v22 = vand.u32 4294901760, %v3743_v1  ;;  %v5801_v1 = vand.u32 4294901760, %v5700_v33  ;;  %v5829_v33 = vld [vmem:[#allocation47_spill] sm:$0xff]  ;;  %v5833_v58 = vld [vmem:[#allocation37_spill] sm:$0xff] }
 0x166   :  { %1967 = vmatprep.subr.mxu1 %v3695_v51  ;;  %1696 = vmatpush1.msra.mxu0 %v5782_v63  ;;  %v5792_v51 = vand.u32 4294901760, %v3763_v9  ;;  %v5805_v9 = vld [vmem:[#allocation31_spill] sm:$0xff]  ;;  %v5834_v63 = vand.u32 4294901760, %v5833_v58 }
 0x167   :  { %1969 = vmatpush1.msra.mxu1 %v3703_v60  ;;  %1700 = vmatprep.subr.mxu0 %v5783_v3  ;;  %v5794_v60 = vand.u32 4294901760, %v3785_v52  ;;  %v5809_v52 = vld [vmem:[#allocation21_spill] sm:$0xff]  ;;  %v5835_v3 = vld [vmem:[#allocation51_spill] sm:$0xff] }
 0x168   :  { %1971 = vmatprep.subr.mxu1 %v3716_v29  ;;  %1704 = vmatpush1.msra.mxu0 %v5784_v35  ;;  %v5796_v29 = vand.u32 4294901760, %v5690_v13  ;;  %v5836_v35 = vld [vmem:[#allocation40_spill] sm:$0xff] }
 0x169   :  { %1973 = vmatpush1.msra.mxu1 %v3725_v47  ;;  %1708 = vmatprep.subr.mxu0 %v5785_v36  ;;  %v5798_v47 = vand.u32 4294901760, %v5694_v28  ;;  %v5823_v28 = vld [vmem:[#allocation43_spill] sm:$0xff]  ;;  %v5837_v36 = vand.u32 4294901760, %v5836_v35 }
 0x16a   :  { %1975 = vmatprep.subr.mxu1 %v3734_v27  ;;  %1712 = vmatpush1.msra.mxu0 %v5786_v49  ;;  %v5800_v27 = vand.u32 4294901760, %v5698_v54  ;;  %v5827_v54 = vld [vmem:[#allocation34_spill] sm:$0xff]  ;;  %v5888_v35 = vld [vmem:[#allocation87_spill] sm:$0xff] }
 0x16b   :  { %1977 = vmatpush1.msra.mxu1 %v3745_v30  ;;  %1716 = vmatprep.subr.mxu0 %v5787_v6  ;;  %v5802_v30 = vld [vmem:[#allocation29_spill] sm:$0xff]  ;;  %v5838_v49 = vld [vmem:[#allocation54_spill] sm:$0xff] }
 0x16c   :  { %1979 = vmatprep.subr.mxu1 %v3754_v55  ;;  %1720 = vmatpush1.msra.mxu0 %v5788_v14  ;;  %v5804_v55 = vand.u32 4294901760, %v5803_v45  ;;  %v5839_v6 = vld [vmem:[#allocation41_spill] sm:$0xff] }
 0x16d   :  { %1981 = vmatpush1.msra.mxu1 %v3765_v10  ;;  %1724 = vmatprep.subr.mxu0 %v5789_v12  ;;  %v5806_v10 = vld [vmem:[#allocation20_spill] sm:$0xff]  ;;  %v5840_v14 = vand.u32 4294901760, %v5839_v6  ;;  %v5841_v12 = vld [vmem:[#allocation55_spill] sm:$0xff]  ;;  %v5891_v6 = vld [vmem:[#allocation90_spill] sm:$0xff] }
 0x16e   :  { %1983 = vmatprep.subr.mxu1 %v3776_v43  ;;  %1728 = vmatpush1.msra.mxu0 %v5790_v22  ;;  %v5807_v39 = vand.u32 4294901760, %v5806_v10  ;;  %v5808_v43 = vld [vmem:[#allocation33_spill] sm:$0xff]  ;;  %v5842_v22 = vld [vmem:[#allocation44_spill] sm:$0xff] }
 0x16f   :  { %1985 = vmatpush1.msra.mxu1 %v3787_v17  ;;  %1732 = vmatprep.subr.mxu0 %v5791_v44  ;;  %v5810_v17 = vand.u32 4294901760, %v5809_v52  ;;  %v5843_v44 = vand.u32 4294901760, %v5842_v22 }
 0x170   :  { %1987 = vmatprep.subr.mxu1 %v3859_v21  ;;  %1736 = vmatpush1.msra.mxu0 %v5792_v51  ;;  %v5811_v21 = vld [vmem:[#allocation35_spill] sm:$0xff]  ;;  %v5844_v51 = vld [vmem:[#allocation58_spill] sm:$0xff] }
 0x171   :  { %1989 = vmatpush1.msra.mxu1 %v3861_v15  ;;  %1740 = vmatprep.subr.mxu0 %v5793_v57  ;;  %v5812_v15 = vld [vmem:[#allocation24_spill] sm:$0xff]  ;;  %v5845_v57 = vld [vmem:[#allocation46_spill] sm:$0xff] }
 0x172   :  { %1991 = vmatprep.subr.mxu1 %v3866_v2  ;;  %1744 = vmatpush1.msra.mxu0 %v5794_v60  ;;  %v5813_v2 = vand.u32 4294901760, %v5812_v15  ;;  %v5846_v60 = vand.u32 4294901760, %v5845_v57 }
 0x173   :  { %1993 = vmatpush1.msra.mxu1 %v3872_v34  ;;  %1748 = vmatprep.subr.mxu0 %v5795_v20  ;;  %v5814_v34 = vld [vmem:[#allocation38_spill] sm:$0xff]  ;;  %v5847_v20 = vld [vmem:[#allocation59_spill] sm:$0xff] }
 0x174   :  { %1995 = vmatprep.subr.mxu1 %v5689_v53  ;;  %1752 = vmatpush1.msra.mxu0 %v5796_v29  ;;  %v5818_v53 = vld [vmem:[#allocation28_spill] sm:$0xff] }
 0x175   :  { %1997 = vmatpush1.msra.mxu1 %v5691_v18  ;;  %1756 = vmatprep.subr.mxu0 %v5797_v0  ;;  %v5819_v13 = vand.u32 4294901760, %v5818_v53  ;;  %v5820_v18 = vld [vmem:[#allocation42_spill] sm:$0xff]  ;;  %v5848_v29 = vld [vmem:[#allocation48_spill] sm:$0xff] }
 0x176   :  { %1999 = vmatprep.subr.mxu1 %v5693_v5  ;;  %1760 = vmatpush1.msra.mxu0 %v5798_v47  ;;  %v5822_v5 = vand.u32 4294901760, %v5821_v16  ;;  %v5849_v0 = vand.u32 4294901760, %v5848_v29  ;;  %v5850_v47 = vld [vmem:[#allocation61_spill] sm:$0xff]  ;;  %v5904_v29 = vand.u32 4294901760, %v5775_v8 }
 0x177   :  { %2001 = vmatpush1.msra.mxu1 %v5695_v42  ;;  %1764 = vmatprep.subr.mxu0 %v5799_v23  ;;  %v5824_v42 = vld [vmem:[#allocation32_spill] sm:$0xff]  ;;  %v5851_v23 = vld [vmem:[#allocation50_spill] sm:$0xff] }
 0x178   :  { %2003 = vmatprep.subr.mxu1 %v5697_v37  ;;  %1768 = vmatpush1.msra.mxu0 %v5800_v27  ;;  %v5825_v31 = vand.u32 4294901760, %v5824_v42  ;;  %v5826_v37 = vld [vmem:[#allocation45_spill] sm:$0xff]  ;;  %v5852_v27 = vand.u32 4294901760, %v5851_v23  ;;  %v2098_v23 = vld [vmem:[%s5267_s5 + $0x68] sm:$0xff] }
 0x179   :  { %2005 = vmatpush1.msra.mxu1 %v5699_v7  ;;  %1772 = vmatprep.subr.mxu0 %v5801_v1  ;;  %v5828_v7 = vand.u32 4294901760, %v5827_v54  ;;  %v5853_v1 = vld [vmem:[#allocation63_spill] sm:$0xff] }
 0x17a   :  { %2007 = vmatprep.subr.mxu1 %v5802_v30  ;;  %1776 = vmatpush1.msra.mxu0 %v5804_v55  ;;  %v5854_v30 = vld [vmem:[#allocation52_spill] sm:$0xff]  ;;  %v5856_v55 = vld [vmem:[#allocation65_spill] sm:$0xff] }
 0x17b   :  { %2009 = vmatpush1.msra.mxu1 %v5805_v9  ;;  %1780 = vmatprep.subr.mxu0 %v5807_v39  ;;  %v5855_v45 = vand.u32 4294901760, %v5854_v30  ;;  %v5857_v9 = vld [vmem:[#allocation53_spill] sm:$0xff]  ;;  %v5859_v39 = vld [vmem:[#allocation67_spill] sm:$0xff]  ;;  %v4679_v30 = vand.u32 4294901760, %v2098_v23 }
 0x17c   :  { %2011 = vmatprep.subr.mxu1 %v5808_v43  ;;  %1784 = vmatpush1.msra.mxu0 %v5810_v17  ;;  %v5858_v10 = vand.u32 4294901760, %v5857_v9  ;;  %v5860_v43 = vld [vmem:[#allocation56_spill] sm:$0xff]  ;;  %v5862_v17 = vld [vmem:[#allocation70_spill] sm:$0xff] }
 0x17d   :  { %2013 = vmatpush2.msra.mxu1 %v5811_v21  ;;  %1788 = vmatprep.subr.mxu0 %v5813_v2  ;;  %v5861_v52 = vand.u32 4294901760, %v5860_v43  ;;  %v5863_v21 = vld [vmem:[#allocation57_spill] sm:$0xff]  ;;  %v5865_v2 = vld [vmem:[#allocation71_spill] sm:$0xff] }
 0x17e   :  { %2015 = vmatprep.subr.mxu1 %v5814_v34  ;;  %1792 = vmatpush1.msra.mxu0 %v5816_v56  ;;  %v5864_v15 = vand.u32 4294901760, %v5863_v21  ;;  %v5866_v34 = vld [vmem:[#allocation60_spill] sm:$0xff]  ;;  %v5868_v56 = vld [vmem:[#allocation74_spill] sm:$0xff]  ;;  %v4706_v21 = vsub.f32 %v2098_v23, %v4679_v30 }
 0x17f   :  { %2017 = vmatpush2.msra.mxu1 %v5817_v61  ;;  %1796 = vmatprep.subr.mxu0 %v5819_v13  ;;  %v5867_v26 = vand.u32 4294901760, %v5866_v34  ;;  %v5869_v61 = vld [vmem:[#allocation62_spill] sm:$0xff]  ;;  %v5871_v13 = vld [vmem:[#allocation75_spill] sm:$0xff] }
 0x180   :  { %2019 = vmatprep.subr.mxu1 %v5820_v18  ;;  %1800 = vmatpush1.msra.mxu0 %v5822_v5  ;;  %v5870_v53 = vand.u32 4294901760, %v5869_v61  ;;  %v5872_v18 = vld [vmem:[#allocation64_spill] sm:$0xff]  ;;  %v5874_v5 = vld [vmem:[#allocation77_spill] sm:$0xff] }
 0x181   :  { %2021 = vmatpush2.msra.mxu1 %v5823_v28  ;;  %1804 = vmatprep.subr.mxu0 %v5825_v31  ;;  %v5873_v16 = vand.u32 4294901760, %v5872_v18  ;;  %v5875_v28 = vld [vmem:[#allocation66_spill] sm:$0xff]  ;;  %v5877_v31 = vld [vmem:[#allocation79_spill] sm:$0xff] }
 0x182   :  { %2023 = vmatprep.subr.mxu1 %v5826_v37  ;;  %1808 = vmatpush1.msra.mxu0 %v5828_v7  ;;  %v5876_v42 = vand.u32 4294901760, %v5875_v28  ;;  %v5878_v37 = vld [vmem:[#allocation68_spill] sm:$0xff]  ;;  %v5880_v7 = vld [vmem:[#allocation81_spill] sm:$0xff] }
 0x183   :  { %2025 = vmatpush2.msra.mxu1 %v5829_v33  ;;  %1812 = vmatprep.subr.mxu0 %v5831_v32  ;;  %v5879_v54 = vand.u32 4294901760, %v5878_v37  ;;  %v5881_v33 = vld [vmem:[#allocation69_spill] sm:$0xff]  ;;  %v5883_v32 = vld [vmem:[#allocation83_spill] sm:$0xff] }
 0x184   :  { %2027 = vmatprep.subr.mxu1 %v5832_v41  ;;  %1816 = vmatpush2.msra.mxu0 %v5834_v63  ;;  %v5882_v24 = vand.u32 4294901760, %v5881_v33  ;;  %v5884_v41 = vld [vmem:[#allocation72_spill] sm:$0xff]  ;;  %v5886_v63 = vld [vmem:[#allocation86_spill] sm:$0xff] }
 0x185   :  { %2029 = vmatpush2.msra.mxu1 %v5835_v3  ;;  %1820 = vmatprep.subr.mxu0 %v5837_v36  ;;  %v5885_v58 = vand.u32 4294901760, %v5884_v41  ;;  %v5887_v3 = vand.u32 4294901760, %v5758_v59  ;;  %v5889_v36 = vld [vmem:[#allocation76_spill] sm:$0xff]  ;;  %v2112_v33 = vld [vmem:[%s5267_s5 + $0xd8] sm:$0xff] }
 0x186   :  { %2031 = vmatprep.subr.mxu1 %v5838_v49  ;;  %1824 = vmatpush2.msra.mxu0 %v5840_v14  ;;  %v5890_v49 = vand.u32 4294901760, %v5889_v36  ;;  %v5892_v14 = vand.u32 4294901760, %v5762_v4  ;;  %v5900_v4 = vand.u32 4294901760, %v5771_v25  ;;  %v2116_v25 = vld [vmem:[%s5267_s5 + $0xf8] sm:$0xff]  ;;  %v2110_v36 = vld [vmem:[%s5267_s5 + $0xc8] sm:$0xff] }
 0x187   :  { %2033 = vmatpush2.msra.mxu1 %v5841_v12  ;;  %1828 = vmatprep.subr.mxu0 %v5843_v44  ;;  %v5893_v12 = vld [vmem:[#allocation80_spill] sm:$0xff]  ;;  %v5895_v44 = vld [vmem:[#allocation82_spill] sm:$0xff] }
 0x188   :  { %2035 = vmatprep.subr.mxu1 %v5844_v51  ;;  %1832 = vmatpush2.msra.mxu0 %v5846_v60  ;;  %v5894_v22 = vand.u32 4294901760, %v5893_v12  ;;  %v5896_v59 = vand.u32 4294901760, %v5895_v44  ;;  %v5897_v51 = vld [vmem:[#allocation84_spill] sm:$0xff]  ;;  %v5899_v60 = vld [vmem:[#allocation99_spill] sm:$0xff]  ;;  %v4770_v12 = vand.u32 4294901760, %v2112_v33 }
 0x189   :  { %2037 = vmatpush2.msra.mxu1 %v5847_v20  ;;  %1836 = vmatprep.subr.mxu0 %v5849_v0  ;;  %v5898_v57 = vand.u32 4294901760, %v5897_v51  ;;  %v5902_v20 = vand.u32 4294901760, %v5773_v62  ;;  %v5906_v0 = vand.u32 4294901760, %v5777_v19  ;;  %v2100_v62 = vld [vmem:[%s5267_s5 + $0x78] sm:$0xff]  ;;  %v2099_v19 = vld [vmem:[%s5267_s5 + $0x70] sm:$0xff] }
 0x18a   :  { %2039 = vmatprep.subr.mxu1 %v5850_v47  ;;  %1840 = vmatpush2.msra.mxu0 %v5852_v27  ;;  %v4662_v8 = vand.u32 4294901760, %v2100_v62  ;;  %v2114_v47 = vld [vmem:[%s5267_s5 + $0xe8] sm:$0xff]  ;;  %v4675_v27 = vand.u32 4294901760, %v2099_v19 }
 0x18b   :  { %2041 = vmatpush2.msra.mxu1 %v5853_v1  ;;  %1844 = vmatprep.subr.mxu0 %v5855_v45  ;;  %v4677_v1 = vand.u32 4294901760, %v2114_v47  ;;  %v2113_v45 = vld [vmem:[%s5267_s5 + $0xe0] sm:$0xff] }
 0x18c   :  { %2043 = vmatprep.subr.mxu1 %v5856_v55  ;;  %1848 = vmatpush2.msra.mxu0 %v5858_v10  ;;  %v2097_v55 = vld [vmem:[%s5267_s5 + $0x60] sm:$0xff]  ;;  %v4691_v10 = vsub.f32 %v2100_v62, %v4662_v8  ;;  %v4696_v43 = vand.u32 4294901760, %v2113_v45 }
 0x18d   :  { %2045 = vmatpush2.msra.mxu1 %v5859_v39  ;;  %1852 = vmatprep.subr.mxu0 %v5861_v52  ;;  %v4700_v52 = vsub.f32 %v2099_v19, %v4675_v27 }
 0x18e   :  { %2047 = vmatprep.subr.mxu1 %v5862_v17  ;;  %1856 = vmatpush2.msra.mxu0 %v5864_v15  ;;  %v4703_v17 = vsub.f32 %v2114_v47, %v4677_v1  ;;  %v4708_v15 = vand.u32 4294901760, %v2097_v55  ;;  %v5529_v34 = vand.u32 4294901760, %v4691_v10 }
 0x18f   :  { %2049 = vmatpush2.msra.mxu1 %v5865_v2  ;;  %1860 = vmatprep.subr.mxu0 %v5867_v26  ;;  %v5526_v61 = vand.u32 4294901760, %v4700_v52 }
 0x190   :  { %2051 = vmatprep.subr.mxu1 %v5868_v56  ;;  %1864 = vmatpush2.msra.mxu0 %v5870_v53  ;;  %v4715_v56 = vsub.f32 %v2113_v45, %v4696_v43  ;;  %v5524_v53 = vand.u32 4294901760, %v4703_v17  ;;  %v4722_v18 = vsub.f32 %v2097_v55, %v4708_v15 }
 0x191   :  { %2053 = vmatpush2.msra.mxu1 %v5871_v13  ;;  %1868 = vmatprep.subr.mxu0 %v5873_v16  ;;  %v5523_v13 = vand.u32 4294901760, %v4706_v21 }
 0x192   :  { %2055 = vmatprep.subr.mxu1 %v5874_v5  ;;  %1872 = vmatpush2.msra.mxu0 %v5876_v42  ;;  %v2240_v5 = vsub.f32 %v4691_v10, %v5529_v34  ;;  %v5521_v42 = vand.u32 4294901760, %v4715_v56  ;;  %v2366_v37 = vsub.f32 %v4703_v17, %v5524_v53 }
 0x193   :  { %2057 = vmatpush2.msra.mxu1 %v5877_v31  ;;  %1876 = vmatprep.subr.mxu0 %v5879_v54  ;;  %v2247_v31 = vsub.f32 %v4700_v52, %v5526_v61  ;;  %v2254_v54 = vsub.f32 %v4706_v21, %v5523_v13 }
 0x194   :  { %2059 = vmatprep.subr.mxu1 %v5880_v7  ;;  %1880 = vmatpush2.msra.mxu0 %v5882_v24  ;;  %v5520_v7 = vand.u32 4294901760, %v4722_v18  ;;  %v2096_v24 = vld [vmem:[%s5267_s5 + $0x58] sm:$0xff] }
 0x195   :  { %2061 = vmatpush2.msra.mxu1 %v5883_v32  ;;  %1884 = vmatprep.subr.mxu0 %v5885_v58  ;;  %v2111_v32 = vld [vmem:[%s5267_s5 + $0xd0] sm:$0xff]  ;;  %v2241_v58 = vand.u32 4294901760, %v2240_v5 }
 0x196   :  { %2063 = vmatprep.subr.mxu1 %v5886_v63  ;;  %1888 = vmatpush2.msra.mxu0 %v5887_v3  ;;  %v2373_v3 = vsub.f32 %v4715_v56, %v5521_v42  ;;  %v4774_v44 = vand.u32 4294901760, %v2111_v32 }
 0x197   :  { %2065 = vmatpush2.msra.mxu1 %v5888_v35  ;;  %1892 = vmatprep.subr.mxu0 %v5890_v49  ;;  %v2095_v35 = vld [vmem:[%s5267_s5 + $0x50] sm:$0xff]  ;;  %v2248_v49 = vand.u32 4294901760, %v2247_v31 }
 0x198   :  { %2067 = vmatprep.subr.mxu1 %v5891_v6  ;;  %1896 = vmatpush2.msra.mxu0 %v5892_v14  ;;  %v2261_v6 = vsub.f32 %v4722_v18, %v5520_v7  ;;  %v2367_v14 = vand.u32 4294901760, %v2366_v37  ;;  %v4776_v51 = vand.u32 4294901760, %v2095_v35 }
 0x199   :  { %2069 = vmatpush2.msra.mxu1 %v5763_v50  ;;  %1900 = vmatprep.subr.mxu0 %v5894_v22  ;;  %v5901_v50 = vand.u32 4294901760, %v5772_v38  ;;  %v4660_v38 = vand.u32 4294901760, %v2116_v25  ;;  %v4772_v22 = vand.u32 4294901760, %v2096_v24 }
 0x19a   :  { %2071 = vmatprep.subr.mxu1 %v5765_v48  ;;  %1904 = vmatpush2.msra.mxu0 %v5896_v59  ;;  %v5903_v48 = vand.u32 4294901760, %v5774_v40  ;;  %v2115_v40 = vld [vmem:[%s5267_s5 + $0xf0] sm:$0xff]  ;;  %v2255_v59 = vand.u32 4294901760, %v2254_v54 }
 0x19b   :  { %2073 = vmatpush2.msra.mxu1 %v5767_v11  ;;  %1908 = vmatprep.subr.mxu0 %v5898_v57  ;;  %v5905_v11 = vand.u32 4294901760, %v5776_v46  ;;  %5907 = vst [vmem:[#allocation10_spill] sm:$0xff] %v4660_v38  ;;  %v4664_v46 = vand.u32 4294901760, %v2115_v40  ;;  %v4688_v9 = vsub.f32 %v2116_v25, %v4660_v38  ;;  %v4778_v57 = vand.u32 4294901760, %v2110_v36 }
 0x19c   :  { %2077 = vmatmul.mubr.f32.vlgmr.msra.gmra.mxu1 %v5899_v60  ;;  %1912 = vmatpush2.msra.mxu0 %v5900_v4  ;;  %v4781_v4 = vsub.f32 %v2112_v33, %v4770_v12  ;;  %v2094_v33 = vld [vmem:[%s5267_s5 + $0x48] sm:$0xff] }
 0x19d   :  { %1916 = vmatprep.subr.mxu0 %v5901_v50  ;;  %5908 = vst [vmem:[#allocation17_spill] sm:$0xff] %v4688_v9  ;;  %v4694_v39 = vsub.f32 %v2115_v40, %v4664_v46  ;;  %v5531_v2 = vand.u32 4294901760, %v4688_v9  ;;  %v4784_v50 = vsub.f32 %v2096_v24, %v4772_v22  ;;  %v4823_v24 = vand.u32 4294901760, %v2094_v33 }
 0x19e   :  { %1920 = vmatpush2.msra.mxu0 %v5902_v20  ;;  %v4787_v20 = vsub.f32 %v2111_v32, %v4774_v44  ;;  %v2109_v32 = vld [vmem:[%s5267_s5 + $0xc0] sm:$0xff] }
 0x19f   :  { %1924 = vmatprep.subr.mxu0 %v5903_v48  ;;  %v5528_v26 = vand.u32 4294901760, %v4694_v39  ;;  %v2352_v16 = vsub.f32 %v4688_v9, %v5531_v2  ;;  %v2262_v48 = vand.u32 4294901760, %v2261_v6  ;;  %v5517_v25 = vand.u32 4294901760, %v4784_v50  ;;  %v2092_v6 = vld [vmem:[%s5267_s5 + $0x38] sm:$0xff] }
 0x1a0   :  { %1928 = vmatpush2.msra.mxu0 %v5904_v29  ;;  %v4791_v29 = vsub.f32 %v2095_v35, %v4776_v51  ;;  %v5515_v62 = vand.u32 4294901760, %v4787_v20  ;;  %v2108_v35 = vld [vmem:[%s5267_s5 + $0xb8] sm:$0xff] }
 0x1a1   :  { %1932 = vmatprep.subr.mxu0 %v5905_v11  ;;  %v2359_v28 = vsub.f32 %v4694_v39, %v5528_v26  ;;  %v2353_v41 = vand.u32 4294901760, %v2352_v16  ;;  %v4794_v11 = vsub.f32 %v2110_v36, %v4778_v57  ;;  %v2268_v23 = vsub.f32 %v4784_v50, %v5517_v25 }
 0x1a2   :  { %1936 = vmatpush2.msra.mxu0 %v5906_v0  ;;  %v5518_v0 = vand.u32 4294901760, %v4781_v4  ;;  %v5514_v40 = vand.u32 4294901760, %v4791_v29  ;;  %v2387_v45 = vsub.f32 %v4787_v20, %v5515_v62 }
 0x1a3   :  { %1940 = vmatmul.mubr.f32.vlgmr.msra.gmra.mxu0 %v5899_v60  ;;  %3003 = vmatprep.subr.mxu0 %v4660_v38  ;;  %v2360_v63 = vand.u32 4294901760, %v2359_v28  ;;  %v2374_v60 = vand.u32 4294901760, %v2373_v3  ;;  %v5513_v19 = vand.u32 4294901760, %v4794_v11  ;;  %v2269_v28 = vand.u32 4294901760, %v2268_v23 }
 0x1a4   :  { %3004 = vmatpush3.msra.mxu0 %v4662_v8  ;;  %3038 = vmatprep.subr.mxu1 %v2353_v41  ;;  %v2380_v47 = vsub.f32 %v4781_v4, %v5518_v0  ;;  %v2275_v55 = vsub.f32 %v4791_v29, %v5514_v40  ;;  %v2388_v31 = vand.u32 4294901760, %v2387_v45  ;;  %v4828_v41 = vand.u32 4294901760, %v2109_v32 }
 0x1a5   :  { %3005 = vmatprep.subr.mxu0 %v4664_v46  ;;  %3039 = vmatpush3.msra.mxu1 %v2241_v58  ;;  %v2394_v16 = vsub.f32 %v4794_v11, %v5513_v19  ;;  %v2093_v58 = vld [vmem:[%s5267_s5 + $0x40] sm:$0xff] }
 0x1a6   :  { %3006 = vmatpush3.msra.mxu0 %v4675_v27  ;;  %3040 = vmatprep.subr.mxu1 %v2360_v63  ;;  %v2381_v5 = vand.u32 4294901760, %v2380_v47  ;;  %v2276_v37 = vand.u32 4294901760, %v2275_v55  ;;  %v4834_v63 = vsub.f32 %v2094_v33, %v4823_v24  ;;  %v4836_v3 = vand.u32 4294901760, %v2093_v58  ;;  %v2091_v55 = vld [vmem:[%s5267_s5 + $0x30] sm:$0xff] }
 0x1a7   :  { %3007 = vmatprep.subr.mxu0 %v4677_v1  ;;  %3041 = vmatpush3.msra.mxu1 %v2248_v49  ;;  %v2395_v54 = vand.u32 4294901760, %v2394_v16  ;;  %v4843_v36 = vsub.f32 %v2109_v32, %v4828_v41  ;;  %v4845_v49 = vand.u32 4294901760, %v2108_v35 }
 0x1a8   :  { %3008 = vmatpush3.msra.mxu0 %v4679_v30  ;;  %3042 = vmatprep.subr.mxu1 %v2367_v14  ;;  %v5511_v14 = vand.u32 4294901760, %v4834_v63 }
 0x1a9   :  { %3009 = vmatprep.subr.mxu0 %v4696_v43  ;;  %3043 = vmatpush3.msra.mxu1 %v2255_v59  ;;  %v4853_v59 = vsub.f32 %v2093_v58, %v4836_v3  ;;  %v5512_v47 = vand.u32 4294901760, %v4843_v36  ;;  %v4863_v23 = vsub.f32 %v2108_v35, %v4845_v49  ;;  %v2090_v35 = vld [vmem:[%s5267_s5 + $0x28] sm:$0xff] }
 0x1aa   :  { %3010 = vmatpush3.msra.mxu0 %v4708_v15  ;;  %3044 = vmatprep.subr.mxu1 %v2374_v60  ;;  %v4855_v60 = vand.u32 4294901760, %v2092_v6  ;;  %v2282_v16 = vsub.f32 %v4834_v63, %v5511_v14 }
 0x1ab   :  { %3011 = vmatprep.subr.mxu0 %v4770_v12  ;;  %3045 = vmatpush3.msra.mxu1 %v2262_v48  ;;  %v2107_v48 = vld [vmem:[%s5267_s5 + $0xb0] sm:$0xff]  ;;  %v5519_v33 = vand.u32 4294901760, %v4863_v23 }
 0x1ac   :  { %3012 = vmatpush3.msra.mxu0 %v4772_v22  ;;  %3046 = vmatprep.subr.mxu1 %v2381_v5  ;;  %v4865_v45 = vand.u32 4294901760, %v2107_v48  ;;  %v5516_v5 = vand.u32 4294901760, %v4853_v59 }
 0x1ad   :  { %3013 = vmatprep.subr.mxu0 %v4774_v44  ;;  %3047 = vmatpush3.msra.mxu1 %v2269_v28  ;;  %v4876_v28 = vsub.f32 %v2092_v6, %v4855_v60  ;;  %v2283_v6 = vand.u32 4294901760, %v2282_v16  ;;  %v2408_v16 = vsub.f32 %v4863_v23, %v5519_v33  ;;  %v4923_v33 = vand.u32 4294901760, %v2090_v35 }
 0x1ae   :  { %3014 = vmatpush3.msra.mxu0 %v4776_v51  ;;  %3048 = vmatprep.subr.mxu1 %v2388_v31  ;;  %v4878_v31 = vand.u32 4294901760, %v2091_v55  ;;  %v4889_v32 = vsub.f32 %v2107_v48, %v4865_v45  ;;  %v2289_v14 = vsub.f32 %v4853_v59, %v5516_v5  ;;  %v2105_v48 = vld [vmem:[%s5267_s5 + $0xa0] sm:$0xff] }
 0x1af   :  { %3015 = vmatprep.subr.mxu0 %v4778_v57  ;;  %3049 = vmatpush3.msra.mxu1 %v2276_v37  ;;  %5909 = vst [vmem:[#allocation11_spill] sm:$0xff] %v4876_v28  ;;  %v2106_v37 = vld [vmem:[%s5267_s5 + $0xa8] sm:$0xff]  ;;  %v2409_v7 = vand.u32 4294901760, %v2408_v16 }
 0x1b0   :  { %3050 = vmatprep.subr.mxu1 %v2395_v54  ;;  %3016 = vmatpush3.msra.mxu0 %v4823_v24  ;;  %v2401_v54 = vsub.f32 %v4843_v36, %v5512_v47  ;;  %5910 = vst [vmem:[#allocation19_spill] sm:$0xff] %v4889_v32  ;;  %v4891_v58 = vand.u32 4294901760, %v2106_v37  ;;  %v5522_v47 = vand.u32 4294901760, %v4876_v28  ;;  %v4902_v19 = vsub.f32 %v2091_v55, %v4878_v31  ;;  %v2089_v55 = vld [vmem:[%s5267_s5 + $0x20] sm:$0xff] }
 0x1b1   :  { %3017 = vmatprep.subr.mxu0 %v4828_v41  ;;  %v5525_v62 = vand.u32 4294901760, %v4889_v32  ;;  %3051 = vmatpush3.msra.mxu1 %v2283_v6  ;;  %v2290_v25 = vand.u32 4294901760, %v2289_v14  ;;  %v4932_v6 = vand.u32 4294901760, %v2105_v48  ;;  %v4943_v16 = vand.u32 4294901760, %v2089_v55 }
 0x1b2   :  { %3018 = vmatpush3.msra.mxu0 %v4836_v3  ;;  %5911 = vst [vmem:[#allocation12_spill] sm:$0xff] %v4902_v19  ;;  %v2402_v40 = vand.u32 4294901760, %v2401_v54  ;;  %v4913_v5 = vsub.f32 %v2106_v37, %v4891_v58  ;;  %v2296_v54 = vsub.f32 %v4876_v28, %v5522_v47  ;;  %v5527_v0 = vand.u32 4294901760, %v4902_v19  ;;  %v2104_v37 = vld [vmem:[%s5267_s5 + $0x98] sm:$0xff] }
 0x1b3   :  { %3019 = vmatprep.subr.mxu0 %v4845_v49  ;;  %v2415_v42 = vsub.f32 %v4889_v32, %v5525_v62  ;;  %v2088_v47 = vld [vmem:[%s5267_s5 + $0x18] sm:$0xff]  ;;  %v2103_v62 = vld [vmem:[%s5267_s5 + $0x90] sm:$0xff]  ;;  %v4960_v34 = vsub.f32 %v2089_v55, %v4943_v16 }
 0x1b4   :  { %3020 = vmatpush3.msra.mxu0 %v4855_v60  ;;  %5912 = vst [vmem:[#allocation22_spill] sm:$0xff] %v4913_v5  ;;  %3052 = vmatprep.subr.mxu1 %v2402_v40  ;;  %v5530_v14 = vand.u32 4294901760, %v4913_v5  ;;  %v2297_v13 = vand.u32 4294901760, %v2296_v54  ;;  %v2303_v53 = vsub.f32 %v4902_v19, %v5527_v0  ;;  %v4941_v40 = vsub.f32 %v2090_v35, %v4923_v33 }
 0x1b5   :  { %3021 = vmatprep.subr.mxu0 %v4865_v45  ;;  %3053 = vmatpush3.msra.mxu1 %v2290_v25  ;;  %v2416_v61 = vand.u32 4294901760, %v2415_v42  ;;  %v4953_v54 = vsub.f32 %v2105_v48, %v4932_v6  ;;  %v4955_v0 = vand.u32 4294901760, %v2104_v37  ;;  %5916 = vst [vmem:[#allocation26_spill] sm:$0xff] %v4960_v34  ;;  %v2087_v42 = vld [vmem:[%s5267_s5 + $0x10] sm:$0xff]  ;;  %v5542_v2 = vand.u32 4294901760, %v4960_v34 }
 0x1b6   :  { %3022 = vmatpush3.msra.mxu0 %v4878_v31  ;;  %5913 = vst [vmem:[#allocation13_spill] sm:$0xff] %v4941_v40  ;;  %3054 = vmatprep.subr.mxu1 %v2409_v7  ;;  %v2422_v25 = vsub.f32 %v4913_v5, %v5530_v14  ;;  %v2304_v35 = vand.u32 4294901760, %v2303_v53  ;;  %v5534_v26 = vand.u32 4294901760, %v4941_v40  ;;  %v4962_v7 = vand.u32 4294901760, %v2088_v47 }
 0x1b7   :  { %3023 = vmatprep.subr.mxu0 %v4891_v58  ;;  %5914 = vst [vmem:[#allocation23_spill] sm:$0xff] %v4953_v54  ;;  %5915 = vst [vmem:[#allocation14_spill] sm:$0xff] %v4955_v0  ;;  %3055 = vmatpush3.msra.mxu1 %v2297_v13  ;;  %v5535_v14 = vand.u32 4294901760, %v4953_v54  ;;  %v4970_v13 = vsub.f32 %v2104_v37, %v4955_v0  ;;  %v4972_v53 = vand.u32 4294901760, %v2103_v62 }
 0x1b8   :  { %3024 = vmatpush3.msra.mxu0 %v4923_v33  ;;  %5917 = vst [vmem:[#allocation15_spill] sm:$0xff] %v4962_v7  ;;  %3056 = vmatprep.subr.mxu1 %v2416_v61  ;;  %v2423_v48 = vand.u32 4294901760, %v2422_v25  ;;  %v2310_v55 = vsub.f32 %v4941_v40, %v5534_v26  ;;  %v4980_v5 = vsub.f32 %v2088_v47, %v4962_v7  ;;  %v2102_v26 = vld [vmem:[%s5267_s5 + $0x88] sm:$0xff] }
 0x1b9   :  { %3025 = vmatprep.subr.mxu0 %v4932_v6  ;;  %5918 = vst [vmem:[#allocation27_spill] sm:$0xff] %v4970_v13  ;;  %5919 = vst [vmem:[#allocation16_spill] sm:$0xff] %v4972_v53  ;;  %3057 = vmatpush3.msra.mxu1 %v2304_v35  ;;  %v2429_v61 = vsub.f32 %v4953_v54, %v5535_v14  ;;  %v4988_v25 = vsub.f32 %v2103_v62, %v4972_v53  ;;  %v4990_v35 = vand.u32 4294901760, %v2087_v42  ;;  %v2086_v14 = vld [vmem:[%s5267_s5 + $0x8] sm:$0xff] }
 0x1ba   :  { %3026 = vmatpush3.msra.mxu0 %v4943_v16  ;;  %5920 = vst [vmem:[#allocation73_spill] sm:$0xff] %v4980_v5  ;;  %3058 = vmatprep.subr.mxu1 %v2423_v48  ;;  %v2311_v47 = vand.u32 4294901760, %v2310_v55  ;;  %v2317_v48 = vsub.f32 %v4960_v34, %v5542_v2  ;;  %v5923_v62 = vand.u32 4294901760, %v4970_v13  ;;  %v2101_v55 = vld [vmem:[%s5267_s5 + $0x80] sm:$0xff]  ;;  %v5926_v19 = vand.u32 4294901760, %v4980_v5 }
 0x1bb   :  { %3027 = vmatprep.subr.mxu0 %v4955_v0  ;;  %5921 = vst [vmem:[#allocation78_spill] sm:$0xff] %v4988_v25  ;;  %5922 = vst [vmem:[#allocation91_spill] sm:$0xff] %v4990_v35  ;;  %v2430_v37 = vand.u32 4294901760, %v2429_v61  ;;  %v2085_v2 = vld [vmem:[%s5267_s5] sm:$0xff]  ;;  %v5015_v34 = vsub.f32 %v2087_v42, %v4990_v35 }
 0x1bc   :  { %3028 = vmatpush3.msra.mxu0 %v4962_v7  ;;  %v2436_v54 = vsub.f32 %v4970_v13, %v5923_v62  ;;  %3059 = vmatpush3.msra.mxu1 %v2311_v47  ;;  %v2318_v61 = vand.u32 4294901760, %v2317_v48  ;;  %v5017_v62 = vand.u32 4294901760, %v2102_v26  ;;  %v2324_v13 = vsub.f32 %v4980_v5, %v5926_v19 }
 0x1bd   :  { %3029 = vmatprep.subr.mxu0 %v4972_v53  ;;  %5924 = vst [vmem:[#allocation93_spill] sm:$0xff] %v5015_v34  ;;  %3060 = vmatprep.subr.mxu1 %v2430_v37  ;;  %v5927_v53 = vand.u32 4294901760, %v4988_v25  ;;  %v5025_v7 = vand.u32 4294901760, %v2086_v14  ;;  %v5558_v47 = vand.u32 4294901760, %v5015_v34  ;;  %v5031_v48 = vand.u32 4294901760, %v2101_v55 }
 0x1be   :  { %3030 = vmatpush3.msra.mxu0 %v4990_v35  ;;  %5925 = vst [vmem:[#allocation95_spill] sm:$0xff] %v5017_v62  ;;  %v2437_v40 = vand.u32 4294901760, %v2436_v54  ;;  %3061 = vmatpush3.msra.mxu1 %v2318_v61  ;;  %v5029_v42 = vsub.f32 %v2102_v26, %v5017_v62  ;;  %v5033_v37 = vand.u32 4294901760, %v2085_v2  ;;  %v2325_v19 = vand.u32 4294901760, %v2324_v13 }
 0x1bf   :  { %v2443_v32 = vsub.f32 %v4988_v25, %v5927_v53  ;;  %5928 = vst [vmem:[#allocation8_spill] sm:$0xff] %v5025_v7  ;;  %5930 = vst [vmem:[#allocation88_spill] sm:$0xff] %v5031_v48  ;;  %3031 = vmatprep.subr.mxu0 %v5017_v62  ;;  %v5037_v5 = vsub.f32 %v2086_v14, %v5025_v7  ;;  %v2331_v53 = vsub.f32 %v5015_v34, %v5558_v47 }
 0x1c0   :  { %5929 = vst [vmem:[#allocation85_spill] sm:$0xff] %v5029_v42  ;;  %5931 = vst [vmem:[#allocation89_spill] sm:$0xff] %v5033_v37  ;;  %3062 = vmatprep.subr.mxu1 %v2437_v40  ;;  %3032 = vmatpush3.msra.mxu0 %v5025_v7  ;;  %v5557_v26 = vand.u32 4294901760, %v5029_v42  ;;  %v5045_v61 = vsub.f32 %v2101_v55, %v5031_v48  ;;  %v5048_v25 = vsub.f32 %v2085_v2, %v5033_v37 }
 0x1c1   :  { %v2444_v54 = vand.u32 4294901760, %v2443_v32  ;;  %5932 = vst [vmem:[#allocation92_spill] sm:$0xff] %v5037_v5  ;;  %3033 = vmatprep.subr.mxu0 %v5031_v48  ;;  %3063 = vmatpush3.msra.mxu1 %v2325_v19  ;;  %v5561_v32 = vand.u32 4294901760, %v5037_v5  ;;  %v2332_v14 = vand.u32 4294901760, %v2331_v53 }
 0x1c2   :  { %5933 = vst [vmem:[#allocation94_spill] sm:$0xff] %v5045_v61  ;;  %5934 = vst [vmem:[#allocation96_spill] sm:$0xff] %v5048_v25  ;;  %3034 = vmatpush3.msra.mxu0 %v5033_v37  ;;  %v2450_v40 = vsub.f32 %v5029_v42, %v5557_v26  ;;  %v5562_v13 = vand.u32 4294901760, %v5045_v61  ;;  %v5566_v55 = vand.u32 4294901760, %v5048_v25 }
 0x1c3   :  { %3064 = vmatprep.subr.mxu1 %v2444_v54  ;;  %3073 = vmatprep.subr.mxu0 %v4688_v9  ;;  %v2338_v2 = vsub.f32 %v5037_v5, %v5561_v32  ;;  %v5935_v32 = vld [vmem:[#allocation98_spill] sm:$0xff] }
 0x1c4   :  { %3065 = vmatpush3.msra.mxu1 %v2332_v14  ;;  %v2451_v19 = vand.u32 4294901760, %v2450_v40  ;;  %v2457_v54 = vsub.f32 %v5045_v61, %v5562_v13  ;;  %v2345_v53 = vsub.f32 %v5048_v25, %v5566_v55  ;;  %v787_v14 = vld [vmem:[%s5266_s4] sm:$0x3]  ;;  %v5936_v13 = vsub.s32 0, %v5935_v32 }
 0x1c5   :  { %v2339_v26 = vand.u32 4294901760, %v2338_v2  ;;  %v5937_v61 = vsub.s32 1, %v5935_v32 }
 0x1c6   :  { %3066 = vmatprep.subr.mxu1 %v2451_v19  ;;  %v2458_v47 = vand.u32 4294901760, %v2457_v54  ;;  %v2346_v42 = vand.u32 4294901760, %v2345_v53  ;;  %v792_v9 = vrot.slane %v787_v14, %v5936_v13 }
 0x1c7   :  { %3067 = vmatpush3.msra.mxu1 %v2339_v26  ;;  %v796_v55 = vrot.slane %v787_v14, %v5937_v61 }
 0x1c8   :  { %3068 = vmatprep.subr.mxu1 %v2458_v47 }
 0x1c9   :  { %3069 = vmatpush3.msra.mxu1 %v2346_v42 }
 0x1ca   :  { %3108 = vmatprep.subr.mxu1 %v4660_v38 }
 0x1d9   :  { %v1332_v2 = vpop.f32.mrf.mxu1 }
 0x1db   :  { %v1334_v47 = vpop.f32.mrf.mxu1 }
 0x1e1   :  { %v939_v40 = vpop.f32.mrf.mxu0 }
 0x1e2   :  { %v940_v54 = vadd.f32 %v939_v40, %v792_v9 }
 0x1e3   :  { %v941_v19 = vpop.f32.mrf.mxu0 }
 0x1e4   :  { %v942_v26 = vadd.f32 %v941_v19, %v796_v55  ;;  %v1333_v42 = vadd.f32 %v1332_v2, %v940_v54 }
 0x1e6   :  { %v1335_v38 = vadd.f32 %v1334_v47, %v942_v26  ;;  %v5943_v26 = vld [vmem:[#allocation12_spill] sm:$0xff]  ;;  %v5944_v47 = vld [vmem:[#allocation91_spill] sm:$0xff] }
 0x21a   :  { %v1676_v25 = vpop.f32.mrf.mxu1 }
 0x21c   :  { %v1678_v48 = vpop.f32.mrf.mxu1 }
 0x222   :  { %v1535_v53 = vpop.f32.mrf.mxu0 }
 0x223   :  { %v1536_v34 = vadd.f32 %v1535_v53, %v1333_v42  ;;  %v5942_v53 = vld [vmem:[#allocation16_spill] sm:$0xff]  ;;  %v5945_v42 = vld [vmem:[#allocation22_spill] sm:$0xff] }
 0x224   :  { %v1537_v5 = vpop.f32.mrf.mxu0 }
 0x225   :  { %v1538_v37 = vadd.f32 %v1537_v5, %v1335_v38  ;;  %v1677_v7 = vadd.f32 %v1676_v25, %v1536_v34 }
 0x227   :  { %v1679_v28 = vadd.f32 %v1678_v48, %v1538_v37  ;;  %v5940_v48 = vld [vmem:[#allocation15_spill] sm:$0xff] }
 0x228   :  { %v5941_v37 = vld [vmem:[#allocation19_spill] sm:$0xff] }
 0x25c   :  { %v2078_v62 = vpop.f32.mrf.mxu1 }
 0x25e   :  { %v2080_v0 = vpop.f32.mrf.mxu1 }
 0x263   :  { %v1941_v35 = vpop.f32.mrf.mxu0 }
 0x264   :  { %v1942_v13 = vadd.f32 %v1941_v35, %v1677_v7  ;;  %v5938_v35 = vld [vmem:[#allocation14_spill] sm:$0xff] }
 0x265   :  { %v1943_v32 = vpop.f32.mrf.mxu0 }
 0x266   :  { %v2079_v61 = vadd.f32 %v2078_v62, %v1942_v13  ;;  %v1944_v14 = vadd.f32 %v1943_v32, %v1679_v28  ;;  %v5939_v62 = vld [vmem:[#allocation11_spill] sm:$0xff]  ;;  %v5947_v32 = vld [vmem:[#allocation13_spill] sm:$0xff] }
 0x267   :  { %v5946_v13 = vld [vmem:[#allocation95_spill] sm:$0xff] }
 0x268   :  { %v2083_v9 = vmax.f32 %v2079_v61, 0.0  ;;  %v2081_v40 = vadd.f32 %v2080_v0, %v1944_v14  ;;  %v5948_v61 = vld [vmem:[#allocation8_spill] sm:$0xff]  ;;  %v5949_v14 = vld [vmem:[#allocation23_spill] sm:$0xff] }
 0x26a   :  { %v5076_v55 = vand.u32 4294901760, %v2083_v9  ;;  %v2084_v2 = vmax.f32 %v2081_v40, 0.0  ;;  %v5951_v40 = vld [vmem:[#allocation26_spill] sm:$0xff] }
 0x26c   :  { %v5079_v19 = vsub.f32 %v2083_v9, %v5076_v55  ;;  %v5081_v54 = vand.u32 4294901760, %v2084_v2  ;;  %v5950_v9 = vld [vmem:[#allocation88_spill] sm:$0xff] }
 0x26e   :  { %v2228_v38 = vand.u32 4294901760, %v5079_v19  ;;  %v2221_v34 = vsub.f32 %v2084_v2, %v5081_v54  ;;  %2461 = vmatprep.mubr.f32.mxu1 %v5081_v54  ;;  %v5952_v2 = vld [vmem:[#allocation89_spill] sm:$0xff] }
 0x26f   :  { %2463 = vmatmul.mubr.f32.vlgmr.msra.gmra.mxu1 %v5076_v55 }
 0x270   :  { %3109 = vmatpush3.msra.mxu1 %v4662_v8  ;;  %v2222_v5 = vand.u32 4294901760, %v2221_v34  ;;  %v2229_v0 = vsub.f32 %v5079_v19, %v2228_v38 }
 0x271   :  { %3110 = vmatprep.subr.mxu1 %v4664_v46 }
 0x272   :  { %3111 = vmatpush3.msra.mxu1 %v4675_v27  ;;  %2705 = vmatprep.mubr.f32.mxu1 %v2222_v5  ;;  %v2223_v28 = vsub.f32 %v2221_v34, %v2222_v5  ;;  %v2230_v25 = vand.u32 4294901760, %v2229_v0  ;;  %v5954_v5 = vld [vmem:[#allocation10_spill] sm:$0xff]  ;;  %v5955_v0 = vld [vmem:[#allocation73_spill] sm:$0xff] }
 0x273   :  { %3112 = vmatprep.subr.mxu1 %v4677_v1 }
 0x274   :  { %3113 = vmatpush3.msra.mxu1 %v4679_v30  ;;  %v2224_v7 = vand.u32 4294901760, %v2223_v28  ;;  %v5956_v28 = vld [vmem:[#allocation78_spill] sm:$0xff] }
 0x275   :  { %3114 = vmatprep.subr.mxu1 %v4696_v43 }
 0x276   :  { %3115 = vmatpush3.msra.mxu1 %v4708_v15  ;;  %2225 = vmatprep.mubr.f32.mxu0 %v2224_v7  ;;  %v5957_v7 = vld [vmem:[#allocation93_spill] sm:$0xff] }
 0x277   :  { %3116 = vmatprep.subr.mxu1 %v4770_v12  ;;  %2231 = vmatmul.mubr.f32.vlgmr.msra.gmra.mxu0 %v2230_v25  ;;  %v5958_v25 = vld [vmem:[#allocation85_spill] sm:$0xff] }
 0x278   :  { %3074 = vmatpush3.msra.mxu0 %v4691_v10  ;;  %3117 = vmatpush3.msra.mxu1 %v4772_v22 }
 0x279   :  { %3075 = vmatprep.subr.mxu0 %v4694_v39  ;;  %2598 = vmatprep.mubr.f32.mxu0 %v2221_v34  ;;  %v5953_v34 = vld [vmem:[#allocation27_spill] sm:$0xff] }
 0x27a   :  { %3118 = vmatprep.subr.mxu1 %v4774_v44  ;;  %3076 = vmatpush3.msra.mxu0 %v4700_v52 }
 0x27b   :  { %3119 = vmatpush3.msra.mxu1 %v4776_v51  ;;  %3077 = vmatprep.subr.mxu0 %v4703_v17 }
 0x27c   :  { %3120 = vmatprep.subr.mxu1 %v4778_v57  ;;  %3078 = vmatpush3.msra.mxu0 %v4706_v21 }
 0x27d   :  { %3121 = vmatpush3.msra.mxu1 %v4823_v24  ;;  %3079 = vmatprep.subr.mxu0 %v4715_v56 }
 0x27e   :  { %3122 = vmatprep.subr.mxu1 %v4828_v41  ;;  %3080 = vmatpush3.msra.mxu0 %v4722_v18 }
 0x27f   :  { %3123 = vmatpush3.msra.mxu1 %v4836_v3  ;;  %3081 = vmatprep.subr.mxu0 %v4781_v4 }
 0x280   :  { %3124 = vmatprep.subr.mxu1 %v4845_v49  ;;  %3082 = vmatpush3.msra.mxu0 %v4784_v50 }
 0x281   :  { %3125 = vmatpush3.msra.mxu1 %v4855_v60  ;;  %3083 = vmatprep.subr.mxu0 %v4787_v20 }
 0x282   :  { %3126 = vmatprep.subr.mxu1 %v4865_v45  ;;  %3084 = vmatpush3.msra.mxu0 %v4791_v29 }
 0x283   :  { %3127 = vmatpush3.msra.mxu1 %v4878_v31  ;;  %3085 = vmatprep.subr.mxu0 %v4794_v11 }
 0x284   :  { %3128 = vmatprep.subr.mxu1 %v4891_v58  ;;  %3086 = vmatpush3.msra.mxu0 %v4834_v63 }
 0x285   :  { %3129 = vmatpush3.msra.mxu1 %v4923_v33  ;;  %3087 = vmatprep.subr.mxu0 %v4843_v36 }
 0x286   :  { %3130 = vmatprep.subr.mxu1 %v4932_v6  ;;  %3088 = vmatpush3.msra.mxu0 %v4853_v59 }
 0x287   :  { %3131 = vmatpush3.msra.mxu1 %v4943_v16  ;;  %3089 = vmatprep.subr.mxu0 %v4863_v23 }
 0x288   :  { %3132 = vmatprep.subr.mxu1 %v5938_v35  ;;  %3090 = vmatpush3.msra.mxu0 %v5939_v62 }
 0x289   :  { %3133 = vmatpush3.msra.mxu1 %v5940_v48  ;;  %3091 = vmatprep.subr.mxu0 %v5941_v37 }
 0x28a   :  { %3134 = vmatprep.subr.mxu1 %v5942_v53  ;;  %3092 = vmatpush3.msra.mxu0 %v5943_v26 }
 0x28b   :  { %3135 = vmatpush3.msra.mxu1 %v5944_v47  ;;  %3093 = vmatprep.subr.mxu0 %v5945_v42 }
 0x28c   :  { %3136 = vmatprep.subr.mxu1 %v5946_v13  ;;  %3094 = vmatpush3.msra.mxu0 %v5947_v32 }
 0x28d   :  { %3137 = vmatpush3.msra.mxu1 %v5948_v61  ;;  %3095 = vmatprep.subr.mxu0 %v5949_v14 }
 0x28e   :  { %3138 = vmatprep.subr.mxu1 %v5950_v9  ;;  %3096 = vmatpush3.msra.mxu0 %v5951_v40 }
 0x28f   :  { %3139 = vmatpush3.msra.mxu1 %v5952_v2  ;;  %3097 = vmatprep.subr.mxu0 %v5953_v34 }
 0x290   :  { %2709 = vmatmul.mubr.f32.vlgmr.msra.gmra.mxu1 %v2228_v38  ;;  %3178 = vmatprep.subr.mxu1 %v5954_v5  ;;  %v5959_v38 = vld [vmem:[#allocation92_spill] sm:$0xff]  ;;  %v5960_v5 = vld [vmem:[#allocation94_spill] sm:$0xff] }
 0x291   :  { %3098 = vmatpush3.msra.mxu0 %v5955_v0  ;;  %3179 = vmatpush3.msra.mxu1 %v4662_v8  ;;  %v5961_v8 = vld [vmem:[#allocation96_spill] sm:$0xff] }
 0x292   :  { %2979 = vmatprep.mubr.f32.mxu1 %v5081_v54  ;;  %3099 = vmatprep.subr.mxu0 %v5956_v28 }
 0x293   :  { %3180 = vmatprep.subr.mxu1 %v4664_v46  ;;  %3100 = vmatpush3.msra.mxu0 %v5957_v7  ;;  %v5962_v46 = vld [vmem:[#allocation17_spill] sm:$0xff] }
 0x294   :  { %3181 = vmatpush3.msra.mxu1 %v4675_v27  ;;  %3101 = vmatprep.subr.mxu0 %v5958_v25  ;;  %v5963_v27 = vand.u32 4294901760, %v5962_v46 }
 0x295   :  { %3182 = vmatprep.subr.mxu1 %v4677_v1  ;;  %3102 = vmatpush3.msra.mxu0 %v5959_v38  ;;  %v5964_v1 = vand.u32 4294901760, %v4691_v10  ;;  %v5968_v10 = vand.u32 4294901760, %v4706_v21  ;;  %v5972_v21 = vand.u32 4294901760, %v4784_v50  ;;  %v5981_v50 = vand.u32 4294901760, %v5941_v37 }
 0x296   :  { %3183 = vmatpush3.msra.mxu1 %v4679_v30  ;;  %3103 = vmatprep.subr.mxu0 %v5960_v5  ;;  %v5965_v30 = vand.u32 4294901760, %v4694_v39  ;;  %v5969_v39 = vand.u32 4294901760, %v4715_v56  ;;  %v5973_v56 = vand.u32 4294901760, %v4787_v20  ;;  %v5982_v20 = vand.u32 4294901760, %v5943_v26 }
 0x297   :  { %3184 = vmatprep.subr.mxu1 %v4696_v43  ;;  %3104 = vmatpush3.msra.mxu0 %v5961_v8  ;;  %v5966_v43 = vand.u32 4294901760, %v4700_v52  ;;  %v5970_v52 = vand.u32 4294901760, %v4722_v18  ;;  %v5974_v18 = vand.u32 4294901760, %v4791_v29  ;;  %v5983_v29 = vand.u32 4294901760, %v5945_v42 }
 0x298   :  { %3185 = vmatpush3.msra.mxu1 %v4708_v15  ;;  %2601 = vmatmul.mubr.f32.vlgmr.msra.gmra.mxu0 %v5079_v19  ;;  %v5967_v15 = vand.u32 4294901760, %v4703_v17  ;;  %v5971_v17 = vand.u32 4294901760, %v4781_v4  ;;  %v5980_v4 = vand.u32 4294901760, %v5939_v62 }
 0x299   :  { %3143 = vmatprep.subr.mxu0 %v5963_v27  ;;  %3186 = vmatprep.subr.mxu1 %v4770_v12  ;;  %v5975_v12 = vand.u32 4294901760, %v4794_v11  ;;  %v5984_v11 = vand.u32 4294901760, %v5947_v32 }
 0x29a   :  { %3144 = vmatpush3.msra.mxu0 %v5964_v1  ;;  %2875 = vmatprep.mubr.f32.mxu0 %v5081_v54  ;;  %v3002_v54 = vld [vmem:[%s5268_s6] ss:$0 sm:$0xff]  ;;  %s3238_s6 = scalar_lea.vmem %s2994_s29, 128 }
 0x29b   :  { %3187 = vmatpush3.msra.mxu1 %v4772_v22  ;;  %3145 = vmatprep.subr.mxu0 %v5965_v30  ;;  %v5976_v22 = vand.u32 4294901760, %v4834_v63  ;;  %v5987_v63 = vand.u32 4294901760, %v5953_v34  ;;  %p3239_p5 = scmp.ne.s32.totalorder %s2994_s29, %s3238_s6  ;;  %p3244_p7 = scmp.lt.s32.totalorder %s3238_s6, %s3238_s6 }
 0x29c   :  { %3188 = vmatprep.subr.mxu1 %v4774_v44  ;;  %3146 = vmatpush3.msra.mxu0 %v5966_v43  ;;  %v5977_v44 = vand.u32 4294901760, %v4843_v36  ;;  %v5989_v36 = vand.u32 4294901760, %v5956_v28 }
 0x29d   :  { %3189 = vmatpush3.msra.mxu1 %v4776_v51  ;;  %3147 = vmatprep.subr.mxu0 %v5967_v15  ;;  %v5978_v51 = vand.u32 4294901760, %v4853_v59  ;;  %v5991_v59 = vand.u32 4294901760, %v5958_v25  ;;  %p3245_p8 = por %p3244_p7, %p3243_p6 }
 0x29e   :  { %3190 = vmatprep.subr.mxu1 %v4778_v57  ;;  %3148 = vmatpush3.msra.mxu0 %v5968_v10  ;;  %v5979_v57 = vand.u32 4294901760, %v4863_v23  ;;  %v5993_v23 = vand.u32 4294901760, %v5960_v5 }
 0x29f   :  { %3191 = vmatpush3.msra.mxu1 %v4823_v24  ;;  %3149 = vmatprep.subr.mxu0 %v5969_v39  ;;  %v5985_v24 = vand.u32 4294901760, %v5949_v14  ;;  %p3246_p9 = pnand %p3245_p8, %p3239_p5 }
 0x2a0   :  { %3192 = vmatprep.subr.mxu1 %v4828_v41  ;;  %3150 = vmatpush3.msra.mxu0 %v5970_v52  ;;  %v5986_v41 = vand.u32 4294901760, %v5951_v40 }
 0x2a1   :  { %3193 = vmatpush3.msra.mxu1 %v4836_v3  ;;  %3151 = vmatprep.subr.mxu0 %v5971_v17  ;;  %v5988_v3 = vand.u32 4294901760, %v5955_v0 }
 0x2a2   :  { %3194 = vmatprep.subr.mxu1 %v4845_v49  ;;  %3152 = vmatpush3.msra.mxu0 %v5972_v21  ;;  %v5990_v49 = vand.u32 4294901760, %v5957_v7 }
 0x2a3   :  { %3195 = vmatpush3.msra.mxu1 %v4855_v60  ;;  %3153 = vmatprep.subr.mxu0 %v5973_v56  ;;  %v5992_v60 = vand.u32 4294901760, %v5959_v38 }
 0x2a4   :  { %3196 = vmatprep.subr.mxu1 %v4865_v45  ;;  %3154 = vmatpush3.msra.mxu0 %v5974_v18  ;;  %v5994_v45 = vand.u32 4294901760, %v5961_v8 }
 0x2a5   :  { %3197 = vmatpush3.msra.mxu1 %v4878_v31  ;;  %3155 = vmatprep.subr.mxu0 %v5975_v12 }
 0x2a6   :  { %3198 = vmatprep.subr.mxu1 %v4891_v58  ;;  %3156 = vmatpush3.msra.mxu0 %v5976_v22 }
 0x2a7   :  { %3199 = vmatpush3.msra.mxu1 %v4923_v33  ;;  %3157 = vmatprep.subr.mxu0 %v5977_v44 }
 0x2a8   :  { %3200 = vmatprep.subr.mxu1 %v4932_v6  ;;  %3158 = vmatpush3.msra.mxu0 %v5978_v51 }
 0x2a9   :  { %3201 = vmatpush3.msra.mxu1 %v4943_v16  ;;  %3159 = vmatprep.subr.mxu0 %v5979_v57 }
 0x2aa   :  { %3202 = vmatprep.subr.mxu1 %v5938_v35  ;;  %3160 = vmatpush3.msra.mxu0 %v5980_v4 }
 0x2ab   :  { %3203 = vmatpush3.msra.mxu1 %v5940_v48  ;;  %3161 = vmatprep.subr.mxu0 %v5981_v50 }
 0x2ac   :  { %3204 = vmatprep.subr.mxu1 %v5942_v53  ;;  %3162 = vmatpush3.msra.mxu0 %v5982_v20 }
 0x2ad   :  { %3205 = vmatpush3.msra.mxu1 %v5944_v47  ;;  %3163 = vmatprep.subr.mxu0 %v5983_v29 }
 0x2ae   :  { %3206 = vmatprep.subr.mxu1 %v5946_v13  ;;  %3164 = vmatpush3.msra.mxu0 %v5984_v11 }
 0x2af   :  { %3207 = vmatpush3.msra.mxu1 %v5948_v61  ;;  %3165 = vmatprep.subr.mxu0 %v5985_v24 }
 0x2b0   :  { %3208 = vmatprep.subr.mxu1 %v5950_v9  ;;  %3166 = vmatpush3.msra.mxu0 %v5986_v41 }
 0x2b1   :  { %3209 = vmatpush3.msra.mxu1 %v5952_v2  ;;  %3167 = vmatprep.subr.mxu0 %v5987_v63 }
 0x2b2   :  { %2981 = vmatmul.mubr.f32.vlgmr.msra.gmra.mxu1 %v5076_v55  ;;  %3168 = vmatpush3.msra.mxu0 %v5988_v3 }
 0x2b3   :  { %3169 = vmatprep.subr.mxu0 %v5989_v36 }
 0x2b4   :  { %3170 = vmatpush3.msra.mxu0 %v5990_v49 }
 0x2b5   :  { %3171 = vmatprep.subr.mxu0 %v5991_v59 }
 0x2b6   :  { %3172 = vmatpush3.msra.mxu0 %v5992_v60 }
 0x2b7   :  { %3173 = vmatprep.subr.mxu0 %v5993_v23 }
 0x2b8   :  { %3174 = vmatpush3.msra.mxu0 %v5994_v45 }
 0x2b9   :  { %2877 = vmatmul.mubr.f32.vlgmr.msra.gmra.mxu0 %v5076_v55 }
 0x32f   :  { %v3070_v33 = vpop.f32.mrf.mxu1 }
 0x331   :  { %v3071_v19 = vpop.f32.mrf.mxu1 }
 0x332   :  { %v3072_v37 = vadd.f32 %v3071_v19, %v3070_v33 }
 0x337   :  { %v3035_v31 = vpop.f32.mrf.mxu0 }
 0x339   :  { %v3036_v58 = vpop.f32.mrf.mxu0 }
 0x33a   :  { %v3037_v16 = vadd.f32 %v3036_v58, %v3035_v31 }
 0x33c   :  { %v2233_v48 = vadd.f32 %v3037_v16, %v3002_v54 }
 0x33e   :  { %v2465_v47 = vadd.f32 %v3072_v37, %v2233_v48 }
 0x350   :  { %v3140_v35 = vpop.f32.mrf.mxu1 }
 0x352   :  { %v3141_v26 = vpop.f32.mrf.mxu1 }
 0x353   :  { %v3142_v32 = vadd.f32 %v3141_v26, %v3140_v35 }
 0x358   :  { %v3105_v6 = vpop.f32.mrf.mxu0 }
 0x35a   :  { %v3106_v62 = vpop.f32.mrf.mxu0 }
 0x35b   :  { %v3107_v53 = vadd.f32 %v3106_v62, %v3105_v6 }
 0x35d   :  { %v2603_v13 = vadd.f32 %v3107_v53, %v2465_v47 }
 0x35f   :  { %v2711_v9 = vadd.f32 %v3142_v32, %v2603_v13 }
 0x372   :  { %v3210_v42 = vpop.f32.mrf.mxu1 }
 0x374   :  { %v3211_v61 = vpop.f32.mrf.mxu1 }
 0x375   :  { %v3212_v2 = vadd.f32 %v3211_v61, %v3210_v42 }
 0x379   :  { %v3175_v55 = vpop.f32.mrf.mxu0 }
 0x37b   :  { %v3176_v14 = vpop.f32.mrf.mxu0 }
 0x37c   :  { %v3177_v40 = vadd.f32 %v3176_v14, %v3175_v55 }
 0x37e   :  { %v2879_v34 = vadd.f32 %v3177_v40, %v2711_v9 }
 0x380   :  { %v2983_v0 = vadd.f32 %v3212_v2, %v2879_v34 }
 0x382   :  { %2986 = vst.msk [vmem:[#allocation5] sm:$0xff] %vm70_vm0, %v2983_v0 }
 0x383   :  { %3249 = shalt.err (!%p3246_p9)
}
 0x384   :  { %2996 = dma.vmem_to_hbm [thread:$0]  %s2994_s29, 128, %s5269_s7, [#allocation4]  }
 0x385   :  { %3260 = dma.done.wait [#allocation4], 128  }
 0x386   :  { %3261 = vsyncadd [#allocation4], 4294967168 }
 0x387   :  { %3000 = vsyncpa [#allocation3], 1 }
 0x388   :  { %3001 = vsyncpa [#allocation4], 1 }

</bundles_post_ra>
